<compile_context>
chip_gen: v7x
topology: tpu7x:2x2x1
jax: 0.10.0
libtpu: 0.0.40
codegen_flags: <defaults>
</compile_context>

<pallas_src>
import jax
import jax.numpy as jnp
from jax.experimental import pallas as pl
from jax.experimental.pallas import tpu as pltpu

HIDDEN_SIZE = 32   # stand-in for C.NET.HIDDEN_SIZE
LN_EPS = 1e-5      # PyTorch nn.LayerNorm default
_HI = jax.lax.Precision.HIGHEST


def _layer_norm(h, gamma, beta):
    mean = jnp.mean(h, axis=-1, keepdims=True)
    xc = h - mean
    var = jnp.mean(xc * xc, axis=-1, keepdims=True)
    return xc * jax.lax.rsqrt(var + LN_EPS) * gamma + beta


# ---------------------------------------------------------------------------
# Fused kernel: one grid step == one MessagePassing layer.
# nodes_out/edges_out are VMEM-resident across the layer axis (same block
# index every step) and double as the layer-to-layer carry.
# ---------------------------------------------------------------------------
def _graphnet_kernel(send_col_ref, recv_col_ref, recv_row_ref,   # indices
                     nodes_ref, edges_ref,                        # [N,H], [E,H]
                     edge_w_ref, edge_v_ref,                      # [5H,H], [5,H]
                     node_w_ref, node_v_ref,                      # [4H,H], [5,H]
                     nodes_out_ref, edges_out_ref):
    N, H = nodes_ref.shape
    E = edges_ref.shape[0]

    # Layer 0: seed the resident carries from the kernel inputs.
    @pl.when(pl.program_id(0) == 0)
    def _():
        nodes_out_ref[...] = nodes_ref[...]
        edges_out_ref[...] = edges_ref[...]

    nodes = nodes_out_ref[...]          # nodes_i
    edges = edges_out_ref[...]          # edges_i

    # --- one-hot gather matrices [E,N] (VPU iota+compare, exact 0/1 weights)
    col = jax.lax.broadcasted_iota(jnp.int32, (E, N), 1)
    send_oh = (col == send_col_ref[...]).astype(jnp.float32)     # [E,N]
    recv_oh = (col == recv_col_ref[...]).astype(jnp.float32)     # [E,N]
    # --- scatter one-hot built directly transposed [N,E] (no XLU transpose)
    row = jax.lax.broadcasted_iota(jnp.int32, (N, E), 0)
    recv_ohT = (row == recv_row_ref[...]).astype(jnp.float32)    # [N,E]

    # gathers (HIGHEST: bf16x3 is exact for 0/1 x f32)
    src = jnp.dot(send_oh, nodes, precision=_HI,
                  preferred_element_type=jnp.float32)            # nodes[senders]
    dst = jnp.dot(recv_oh, nodes, precision=_HI,
                  preferred_element_type=jnp.float32)            # nodes[receivers]

    # --- edge model: Linear(3H->H split) -> ReLU -> Linear -> ReLU -> Linear -> LN
    ew, ev = edge_w_ref, edge_v_ref
    h = (jnp.dot(dst,   ew[0 * H:1 * H, :], preferred_element_type=jnp.float32)
         + jnp.dot(src,   ew[1 * H:2 * H, :], preferred_element_type=jnp.float32)
         + jnp.dot(edges, ew[2 * H:3 * H, :], preferred_element_type=jnp.float32)
         + ev[0:1, :])
    h = jnp.maximum(h, 0.0)
    h = jnp.dot(h, ew[3 * H:4 * H, :],
                preferred_element_type=jnp.float32) + ev[1:2, :]
    h = jnp.maximum(h, 0.0)
    h = jnp.dot(h, ew[4 * H:5 * H, :],
                preferred_element_type=jnp.float32) + ev[2:3, :]
    e_out = _layer_norm(h, ev[3:4, :], ev[4:5, :])               # [E,H]

    edges_out_ref[...] = edges + e_out                            # fused residual

    # --- scatter_add onto receivers: plain matmul with the transposed one-hot
    effects = jnp.dot(recv_ohT, e_out, precision=_HI,
                      preferred_element_type=jnp.float32)        # [N,H]

    # --- node model: Linear(2H->H split) -> ReLU -> Linear -> ReLU -> Linear -> LN
    nw, nv = node_w_ref, node_v_ref
    h = (jnp.dot(nodes,   nw[0 * H:1 * H, :], preferred_element_type=jnp.float32)
         + jnp.dot(effects, nw[1 * H:2 * H, :], preferred_element_type=jnp.float32)
         + nv[0:1, :])
    h = jnp.maximum(h, 0.0)
    h = jnp.dot(h, nw[2 * H:3 * H, :],
                preferred_element_type=jnp.float32) + nv[1:2, :]
    h = jnp.maximum(h, 0.0)
    h = jnp.dot(h, nw[3 * H:4 * H, :],
                preferred_element_type=jnp.float32) + nv[2:3, :]
    n_out = _layer_norm(h, nv[3:4, :], nv[4:5, :])               # [N,H]

    nodes_out_ref[...] = nodes + n_out                            # fused residual


# ---------------------------------------------------------------------------
# Parameter packing (done once, outside the hot path).
# ---------------------------------------------------------------------------
def pack_graphnet_params(layer_params):
    edge_w = jnp.stack([jnp.concatenate(
        [ep["w1_dst"], ep["w1_src"], ep["w1_edge"], ep["w2"], ep["w3"]], axis=0)
        for ep, _ in layer_params])                               # [L,5H,H]
    edge_v = jnp.stack([jnp.concatenate(
        [ep["b1"], ep["b2"], ep["b3"], ep["gamma"], ep["beta"]], axis=0)
        for ep, _ in layer_params])                               # [L,5,H]
    node_w = jnp.stack([jnp.concatenate(
        [npar["w1_node"], npar["w1_eff"], npar["w2"], npar["w3"]], axis=0)
        for _, npar in layer_params])                             # [L,4H,H]
    node_v = jnp.stack([jnp.concatenate(
        [npar["b1"], npar["b2"], npar["b3"], npar["gamma"], npar["beta"]], axis=0)
        for _, npar in layer_params])                             # [L,5,H]
    return dict(edge_w=edge_w, edge_v=edge_v, node_w=node_w, node_v=node_v)


def graphnet_forward(nodes, edges, senders, receivers, packed):
    N, H = nodes.shape
    E = edges.shape[0]
    L = packed["edge_w"].shape[0]

    send_col = senders.astype(jnp.int32).reshape(E, 1)
    recv_col = receivers.astype(jnp.int32).reshape(E, 1)
    recv_row = receivers.astype(jnp.int32).reshape(1, E)

    fixed2 = lambda l: (0, 0)
    nodes_new, edges_new = pl.pallas_call(
        _graphnet_kernel,
        grid=(L,),
        out_shape=(jax.ShapeDtypeStruct((N, H), jnp.float32),
                   jax.ShapeDtypeStruct((E, H), jnp.float32)),
        in_specs=[
            pl.BlockSpec((E, 1), fixed2),                         # senders  [E,1]
            pl.BlockSpec((E, 1), fixed2),                         # receivers[E,1]
            pl.BlockSpec((1, E), fixed2),                         # receivers[1,E]
            pl.BlockSpec((N, H), fixed2),                         # nodes
            pl.BlockSpec((E, H), fixed2),                         # edges
            pl.BlockSpec((None, 5 * H, H), lambda l: (l, 0, 0)),  # edge weights
            pl.BlockSpec((None, 5, H), lambda l: (l, 0, 0)),      # edge b/gamma/beta
            pl.BlockSpec((None, 4 * H, H), lambda l: (l, 0, 0)),  # node weights
            pl.BlockSpec((None, 5, H), lambda l: (l, 0, 0)),      # node b/gamma/beta
        ],
        out_specs=(pl.BlockSpec((N, H), fixed2),
                   pl.BlockSpec((E, H), fixed2)),
        compiler_params=pltpu.CompilerParams(
            dimension_semantics=("arbitrary",)),
    )(send_col, recv_col, recv_row, nodes, edges,
      packed["edge_w"], packed["edge_v"], packed["node_w"], packed["node_v"])
    return nodes_new, edges_new


# ---------------------------------------------------------------------------
# Deterministic parameter init (mirrors PyTorch nn.Linear / nn.LayerNorm,
# with the first Linear stored as split [H,H] blocks; weights are [in,out]).
# ---------------------------------------------------------------------------
def _uniform(key, fan_in, shape):
    bound = 1.0 / (fan_in ** 0.5)
    return jax.random.uniform(key, shape, jnp.float32, -bound, bound)


def init_edge_params(key, hidden):
    ks = jax.random.split(key, 8)
    f1 = 3 * hidden
    return dict(
        w1_dst=_uniform(ks[0], f1, (hidden, hidden)),
        w1_src=_uniform(ks[1], f1, (hidden, hidden)),
        w1_edge=_uniform(ks[2], f1, (hidden, hidden)),
        b1=_uniform(ks[3], f1, (1, hidden)),
        w2=_uniform(ks[4], hidden, (hidden, hidden)),
        b2=_uniform(ks[5], hidden, (1, hidden)),
        w3=_uniform(ks[6], hidden, (hidden, hidden)),
        b3=_uniform(ks[7], hidden, (1, hidden)),
        gamma=jnp.ones((1, hidden), jnp.float32),
        beta=jnp.zeros((1, hidden), jnp.float32),
    )


def init_node_params(key, hidden):
    ks = jax.random.split(key, 7)
    f1 = 2 * hidden
    return dict(
        w1_node=_uniform(ks[0], f1, (hidden, hidden)),
        w1_eff=_uniform(ks[1], f1, (hidden, hidden)),
        b1=_uniform(ks[2], f1, (1, hidden)),
        w2=_uniform(ks[3], hidden, (hidden, hidden)),
        b2=_uniform(ks[4], hidden, (1, hidden)),
        w3=_uniform(ks[5], hidden, (hidden, hidden)),
        b3=_uniform(ks[6], hidden, (1, hidden)),
        gamma=jnp.ones((1, hidden), jnp.float32),
        beta=jnp.zeros((1, hidden), jnp.float32),
    )


# ---------------------------------------------------------------------------
# Pure-JAX reference (matches the PyTorch forward; same default matmul
# precision as the kernel's MLP path so the comparison is apples-to-apples).
# ---------------------------------------------------------------------------
def _mlp_ln_ref(x_parts, w_parts, b1, w2, b2, w3, b3, gamma, beta):
    h = b1
    for xp, wp in zip(x_parts, w_parts):
        h = h + jnp.dot(xp, wp)
    h = jnp.maximum(h, 0.0)
    h = jnp.maximum(jnp.dot(h, w2) + b2, 0.0)
    h = jnp.dot(h, w3) + b3
    mean = jnp.mean(h, axis=-1, keepdims=True)
    var = jnp.mean((h - mean) ** 2, axis=-1, keepdims=True)
    return (h - mean) * jax.lax.rsqrt(var + LN_EPS) * gamma + beta


def graphnet_reference(nodes, edges, senders, receivers, layer_params):
    for edge_p, node_p in layer_params:
        src = nodes[senders]
        dst = nodes[receivers]
        e_out = _mlp_ln_ref(
            (dst, src, edges),
            (edge_p["w1_dst"], edge_p["w1_src"], edge_p["w1_edge"]),
            edge_p["b1"], edge_p["w2"], edge_p["b2"], edge_p["w3"], edge_p["b3"],
            edge_p["gamma"], edge_p["beta"])
        effects = jnp.zeros_like(nodes).at[receivers].add(e_out)
        n_out = _mlp_ln_ref(
            (nodes, effects),
            (node_p["w1_node"], node_p["w1_eff"]),
            node_p["b1"], node_p["w2"], node_p["b2"], node_p["w3"], node_p["b3"],
            node_p["gamma"], node_p["beta"])
        nodes = nodes + n_out
        edges = edges + e_out
    return nodes, edges


# ---------------------------------------------------------------------------
if __name__ == "__main__":
    H = HIDDEN_SIZE
    N = 16        # number of nodes
    E = 32        # number of edges
    LAYERS = 2    # GraphNet(layers=2) — exercises the fused layer loop

    key = jax.random.PRNGKey(0)
    k_nodes, k_edges, k_send, k_recv, k_layers = jax.random.split(key, 5)

    nodes = jax.random.normal(k_nodes, (N, H), jnp.float32)
    edges = jax.random.normal(k_edges, (E, H), jnp.float32)
    senders = jax.random.randint(k_send, (E,), 0, N, jnp.int32)
    receivers = jax.random.randint(k_recv, (E,), 0, N, jnp.int32)

    layer_keys = jax.random.split(k_layers, 2 * LAYERS)
    layer_params = [(init_edge_params(layer_keys[2 * i], H),
                     init_node_params(layer_keys[2 * i + 1], H))
                    for i in range(LAYERS)]

    packed = pack_graphnet_params(layer_params)

    fwd = jax.jit(graphnet_forward)
    nodes_out, edges_out = fwd(nodes, edges, senders, receivers, packed)
    jax.block_until_ready((nodes_out, edges_out))

    nodes_ref, edges_ref = graphnet_reference(nodes, edges, senders, receivers,
                                              layer_params)

    assert nodes_out.shape == (N, H) and edges_out.shape == (E, H)
    assert bool(jnp.all(jnp.isfinite(nodes_out)))
    assert bool(jnp.all(jnp.isfinite(edges_out)))
    assert bool(jnp.allclose(nodes_out, nodes_ref, atol=2e-2, rtol=2e-2))
    assert bool(jnp.allclose(edges_out, edges_ref, atol=2e-2, rtol=2e-2))
    print("KERNEL_OK")
</pallas_src>

<mosaic_0001>
module attributes {stable_mosaic.version = 11 : i64} {
  func.func @_graphnet_kernel(%arg0: i32, %arg1: memref<32x1xi32, #tpu.memory_space<vmem>>, %arg2: memref<32x1xi32, #tpu.memory_space<vmem>>, %arg3: memref<1x32xi32, #tpu.memory_space<vmem>>, %arg4: memref<16x32xf32, #tpu.memory_space<vmem>>, %arg5: memref<32x32xf32, #tpu.memory_space<vmem>>, %arg6: memref<1x160x32xf32, #tpu.memory_space<vmem>>, %arg7: memref<1x5x32xf32, #tpu.memory_space<vmem>>, %arg8: memref<1x128x32xf32, #tpu.memory_space<vmem>>, %arg9: memref<1x5x32xf32, #tpu.memory_space<vmem>>, %arg10: memref<16x32xf32, #tpu.memory_space<vmem>>, %arg11: memref<32x32xf32, #tpu.memory_space<vmem>>) attributes {dimension_semantics = [#tpu.dimension_semantics<arbitrary>], iteration_bounds = array<i64: 2>, scalar_prefetch = 0 : i64, scratch_operands = 0 : i64, tpu.core_type = #tpu.core_type<tc>, window_params = [{pipeline_mode = #tpu.pipeline_mode<synchronous>, transform_indices = @transform_0, window_bounds = array<i64: 32, 1>}, {pipeline_mode = #tpu.pipeline_mode<synchronous>, transform_indices = @transform_1, window_bounds = array<i64: 32, 1>}, {pipeline_mode = #tpu.pipeline_mode<synchronous>, transform_indices = @transform_2, window_bounds = array<i64: 1, 32>}, {pipeline_mode = #tpu.pipeline_mode<synchronous>, transform_indices = @transform_3, window_bounds = array<i64: 16, 32>}, {pipeline_mode = #tpu.pipeline_mode<synchronous>, transform_indices = @transform_4, window_bounds = array<i64: 32, 32>}, {transform_indices = @transform_5, window_bounds = array<i64: 1, 160, 32>}, {transform_indices = @transform_6, window_bounds = array<i64: 1, 5, 32>}, {transform_indices = @transform_7, window_bounds = array<i64: 1, 128, 32>}, {transform_indices = @transform_8, window_bounds = array<i64: 1, 5, 32>}, {pipeline_mode = #tpu.pipeline_mode<synchronous>, transform_indices = @transform_9, window_bounds = array<i64: 16, 32>}, {pipeline_mode = #tpu.pipeline_mode<synchronous>, transform_indices = @transform_10, window_bounds = array<i64: 32, 32>}]} {
    %c0_i32 = arith.constant 0 : i32
    %0 = arith.cmpi eq, %arg0, %c0_i32 : i32
    %1 = arith.extui %0 : i1 to i32
    %c0_i32_0 = arith.constant 0 : i32
    %2 = arith.cmpi ne, %1, %c0_i32_0 : i32
    scf.if %2 {
      %c0_88 = arith.constant 0 : index
      %c0_89 = arith.constant 0 : index
      %139 = vector.load %arg4[%c0_88, %c0_89] : memref<16x32xf32, #tpu.memory_space<vmem>>, vector<16x32xf32>
      %c0_90 = arith.constant 0 : index
      %c0_91 = arith.constant 0 : index
      %140 = vector.load %arg10[%c0_90, %c0_91] : memref<16x32xf32, #tpu.memory_space<vmem>>, vector<16x32xf32>
      tpu.vector_store %arg10[%c0_90, %c0_91], %139 {strides = array<i32>} : memref<16x32xf32, #tpu.memory_space<vmem>>, vector<16x32xf32>,
      %c0_92 = arith.constant 0 : index
      %c0_93 = arith.constant 0 : index
      %141 = vector.load %arg5[%c0_92, %c0_93] : memref<32x32xf32, #tpu.memory_space<vmem>>, vector<32x32xf32>
      %c0_94 = arith.constant 0 : index
      %c0_95 = arith.constant 0 : index
      %142 = vector.load %arg11[%c0_94, %c0_95] : memref<32x32xf32, #tpu.memory_space<vmem>>, vector<32x32xf32>
      tpu.vector_store %arg11[%c0_94, %c0_95], %141 {strides = array<i32>} : memref<32x32xf32, #tpu.memory_space<vmem>>, vector<32x32xf32>,
    } else {
    }
    %c0 = arith.constant 0 : index
    %c0_1 = arith.constant 0 : index
    %3 = vector.load %arg10[%c0, %c0_1] : memref<16x32xf32, #tpu.memory_space<vmem>>, vector<16x32xf32>
    %c0_2 = arith.constant 0 : index
    %c0_3 = arith.constant 0 : index
    %4 = vector.load %arg11[%c0_2, %c0_3] : memref<32x32xf32, #tpu.memory_space<vmem>>, vector<32x32xf32>
    %5 = tpu.iota {dimensions = array<i32: 1>} : vector<32x16xi32>
    %c0_4 = arith.constant 0 : index
    %c0_5 = arith.constant 0 : index
    %6 = vector.load %arg1[%c0_4, %c0_5] : memref<32x1xi32, #tpu.memory_space<vmem>>, vector<32x1xi32>
    %7 = vector.broadcast %6 : vector<32x1xi32> to vector<32x16xi32>
    %8 = arith.cmpi eq, %5, %7 : vector<32x16xi32>
    %9 = arith.extui %8 : vector<32x16xi1> to vector<32x16xi32>
    %10 = arith.sitofp %9 : vector<32x16xi32> to vector<32x16xf32>
    %c0_6 = arith.constant 0 : index
    %c0_7 = arith.constant 0 : index
    %11 = vector.load %arg2[%c0_6, %c0_7] : memref<32x1xi32, #tpu.memory_space<vmem>>, vector<32x1xi32>
    %12 = vector.broadcast %11 : vector<32x1xi32> to vector<32x16xi32>
    %13 = arith.cmpi eq, %5, %12 : vector<32x16xi32>
    %14 = arith.extui %13 : vector<32x16xi1> to vector<32x16xi32>
    %15 = arith.sitofp %14 : vector<32x16xi32> to vector<32x16xf32>
    %16 = tpu.iota {dimensions = array<i32: 0>} : vector<16x32xi32>
    %c0_8 = arith.constant 0 : index
    %c0_9 = arith.constant 0 : index
    %17 = vector.load %arg3[%c0_8, %c0_9] : memref<1x32xi32, #tpu.memory_space<vmem>>, vector<1x32xi32>
    %18 = vector.broadcast %17 : vector<1x32xi32> to vector<16x32xi32>
    %19 = arith.cmpi eq, %16, %18 : vector<16x32xi32>
    %20 = arith.extui %19 : vector<16x32xi1> to vector<16x32xi32>
    %21 = arith.sitofp %20 : vector<16x32xi32> to vector<16x32xf32>
    %cst = arith.constant dense<0.000000e+00> : vector<32x32xf32>
    %22 = tpu.matmul %10, %3, %cst {dimension_numbers = #tpu.dot_dimension_numbers<[1], [0], [0], [1], [0, 0, 1, 1], [], []>, precision = #tpu.contract_precision<fp32>} : vector<32x16xf32>, vector<16x32xf32>, vector<32x32xf32> -> vector<32x32xf32>
    %cst_10 = arith.constant dense<0.000000e+00> : vector<32x32xf32>
    %23 = tpu.matmul %15, %3, %cst_10 {dimension_numbers = #tpu.dot_dimension_numbers<[1], [0], [0], [1], [0, 0, 1, 1], [], []>, precision = #tpu.contract_precision<fp32>} : vector<32x16xf32>, vector<16x32xf32>, vector<32x32xf32> -> vector<32x32xf32>
    %c0_11 = arith.constant 0 : index
    %c0_12 = arith.constant 0 : index
    %c0_13 = arith.constant 0 : index
    %24 = vector.load %arg6[%c0_11, %c0_12, %c0_13] : memref<1x160x32xf32, #tpu.memory_space<vmem>>, vector<1x32x32xf32>
    %25 = vector.shape_cast %24 : vector<1x32x32xf32> to vector<32x32xf32>
    %cst_14 = arith.constant dense<0.000000e+00> : vector<32x32xf32>
    %26 = tpu.matmul %23, %25, %cst_14 {dimension_numbers = #tpu.dot_dimension_numbers<[1], [0], [0], [1], [0, 0, 1, 1], [], []>} : vector<32x32xf32>, vector<32x32xf32>, vector<32x32xf32> -> vector<32x32xf32>
    %c0_15 = arith.constant 0 : index
    %c32 = arith.constant 32 : index
    %c0_16 = arith.constant 0 : index
    %27 = vector.load %arg6[%c0_15, %c32, %c0_16] : memref<1x160x32xf32, #tpu.memory_space<vmem>>, vector<1x32x32xf32>
    %28 = vector.shape_cast %27 : vector<1x32x32xf32> to vector<32x32xf32>
    %cst_17 = arith.constant dense<0.000000e+00> : vector<32x32xf32>
    %29 = tpu.matmul %22, %28, %cst_17 {dimension_numbers = #tpu.dot_dimension_numbers<[1], [0], [0], [1], [0, 0, 1, 1], [], []>} : vector<32x32xf32>, vector<32x32xf32>, vector<32x32xf32> -> vector<32x32xf32>
    %30 = arith.addf %26, %29 : vector<32x32xf32>
    %c0_18 = arith.constant 0 : index
    %c64 = arith.constant 64 : index
    %c0_19 = arith.constant 0 : index
    %31 = vector.load %arg6[%c0_18, %c64, %c0_19] : memref<1x160x32xf32, #tpu.memory_space<vmem>>, vector<1x32x32xf32>
    %32 = vector.shape_cast %31 : vector<1x32x32xf32> to vector<32x32xf32>
    %cst_20 = arith.constant dense<0.000000e+00> : vector<32x32xf32>
    %33 = tpu.matmul %4, %32, %cst_20 {dimension_numbers = #tpu.dot_dimension_numbers<[1], [0], [0], [1], [0, 0, 1, 1], [], []>} : vector<32x32xf32>, vector<32x32xf32>, vector<32x32xf32> -> vector<32x32xf32>
    %34 = arith.addf %30, %33 : vector<32x32xf32>
    %c0_21 = arith.constant 0 : index
    %c0_22 = arith.constant 0 : index
    %c0_23 = arith.constant 0 : index
    %35 = vector.load %arg7[%c0_21, %c0_22, %c0_23] : memref<1x5x32xf32, #tpu.memory_space<vmem>>, vector<1x1x32xf32>
    %36 = vector.shape_cast %35 : vector<1x1x32xf32> to vector<1x32xf32>
    %37 = vector.broadcast %36 : vector<1x32xf32> to vector<32x32xf32>
    %38 = arith.addf %34, %37 : vector<32x32xf32>
    %cst_24 = arith.constant 0.000000e+00 : f32
    %39 = vector.broadcast %cst_24 : f32 to vector<32x32xf32>
    %40 = arith.maximumf %38, %39 : vector<32x32xf32>
    %c0_25 = arith.constant 0 : index
    %c96 = arith.constant 96 : index
    %c0_26 = arith.constant 0 : index
    %41 = vector.load %arg6[%c0_25, %c96, %c0_26] : memref<1x160x32xf32, #tpu.memory_space<vmem>>, vector<1x32x32xf32>
    %42 = vector.shape_cast %41 : vector<1x32x32xf32> to vector<32x32xf32>
    %cst_27 = arith.constant dense<0.000000e+00> : vector<32x32xf32>
    %43 = tpu.matmul %40, %42, %cst_27 {dimension_numbers = #tpu.dot_dimension_numbers<[1], [0], [0], [1], [0, 0, 1, 1], [], []>} : vector<32x32xf32>, vector<32x32xf32>, vector<32x32xf32> -> vector<32x32xf32>
    %c0_28 = arith.constant 0 : index
    %c1 = arith.constant 1 : index
    %c0_29 = arith.constant 0 : index
    %44 = vector.load %arg7[%c0_28, %c1, %c0_29] : memref<1x5x32xf32, #tpu.memory_space<vmem>>, vector<1x1x32xf32>
    %45 = vector.shape_cast %44 : vector<1x1x32xf32> to vector<1x32xf32>
    %46 = vector.broadcast %45 : vector<1x32xf32> to vector<32x32xf32>
    %47 = arith.addf %43, %46 : vector<32x32xf32>
    %cst_30 = arith.constant 0.000000e+00 : f32
    %48 = vector.broadcast %cst_30 : f32 to vector<32x32xf32>
    %49 = arith.maximumf %47, %48 : vector<32x32xf32>
    %c0_31 = arith.constant 0 : index
    %c128 = arith.constant 128 : index
    %c0_32 = arith.constant 0 : index
    %50 = vector.load %arg6[%c0_31, %c128, %c0_32] : memref<1x160x32xf32, #tpu.memory_space<vmem>>, vector<1x32x32xf32>
    %51 = vector.shape_cast %50 : vector<1x32x32xf32> to vector<32x32xf32>
    %cst_33 = arith.constant dense<0.000000e+00> : vector<32x32xf32>
    %52 = tpu.matmul %49, %51, %cst_33 {dimension_numbers = #tpu.dot_dimension_numbers<[1], [0], [0], [1], [0, 0, 1, 1], [], []>} : vector<32x32xf32>, vector<32x32xf32>, vector<32x32xf32> -> vector<32x32xf32>
    %c0_34 = arith.constant 0 : index
    %c2 = arith.constant 2 : index
    %c0_35 = arith.constant 0 : index
    %53 = vector.load %arg7[%c0_34, %c2, %c0_35] : memref<1x5x32xf32, #tpu.memory_space<vmem>>, vector<1x1x32xf32>
    %54 = vector.shape_cast %53 : vector<1x1x32xf32> to vector<1x32xf32>
    %55 = vector.broadcast %54 : vector<1x32xf32> to vector<32x32xf32>
    %56 = arith.addf %52, %55 : vector<32x32xf32>
    %c0_36 = arith.constant 0 : index
    %c3 = arith.constant 3 : index
    %c0_37 = arith.constant 0 : index
    %57 = vector.load %arg7[%c0_36, %c3, %c0_37] : memref<1x5x32xf32, #tpu.memory_space<vmem>>, vector<1x1x32xf32>
    %58 = vector.shape_cast %57 : vector<1x1x32xf32> to vector<1x32xf32>
    %c0_38 = arith.constant 0 : index
    %c4 = arith.constant 4 : index
    %c0_39 = arith.constant 0 : index
    %59 = vector.load %arg7[%c0_38, %c4, %c0_39] : memref<1x5x32xf32, #tpu.memory_space<vmem>>, vector<1x1x32xf32>
    %60 = vector.shape_cast %59 : vector<1x1x32xf32> to vector<1x32xf32>
    %cst_40 = arith.constant dense<0.000000e+00> : vector<32xf32>
    %61 = vector.multi_reduction <add>, %56, %cst_40 [1] : vector<32x32xf32> to vector<32xf32>
    %62 = vector.shape_cast %61 : vector<32xf32> to vector<32x1xf32>
    %cst_41 = arith.constant 3.200000e+01 : f32
    %63 = vector.broadcast %cst_41 : f32 to vector<32x1xf32>
    %64 = arith.divf %62, %63 : vector<32x1xf32>
    %65 = vector.broadcast %64 : vector<32x1xf32> to vector<32x32xf32>
    %66 = arith.subf %56, %65 : vector<32x32xf32>
    %67 = arith.mulf %66, %66 : vector<32x32xf32>
    %cst_42 = arith.constant dense<0.000000e+00> : vector<32xf32>
    %68 = vector.multi_reduction <add>, %67, %cst_42 [1] : vector<32x32xf32> to vector<32xf32>
    %69 = vector.shape_cast %68 : vector<32xf32> to vector<32x1xf32>
    %cst_43 = arith.constant 3.200000e+01 : f32
    %70 = vector.broadcast %cst_43 : f32 to vector<32x1xf32>
    %71 = arith.divf %69, %70 : vector<32x1xf32>
    %cst_44 = arith.constant 9.99999974E-6 : f32
    %72 = vector.broadcast %cst_44 : f32 to vector<32x1xf32>
    %73 = arith.addf %71, %72 : vector<32x1xf32>
    %74 = math.rsqrt %73 : vector<32x1xf32>
    %75 = vector.broadcast %74 : vector<32x1xf32> to vector<32x32xf32>
    %76 = arith.mulf %66, %75 : vector<32x32xf32>
    %77 = vector.broadcast %58 : vector<1x32xf32> to vector<32x32xf32>
    %78 = arith.mulf %76, %77 : vector<32x32xf32>
    %79 = vector.broadcast %60 : vector<1x32xf32> to vector<32x32xf32>
    %80 = arith.addf %78, %79 : vector<32x32xf32>
    %81 = arith.addf %4, %80 : vector<32x32xf32>
    %c0_45 = arith.constant 0 : index
    %c0_46 = arith.constant 0 : index
    %82 = vector.load %arg11[%c0_45, %c0_46] : memref<32x32xf32, #tpu.memory_space<vmem>>, vector<32x32xf32>
    tpu.vector_store %arg11[%c0_45, %c0_46], %81 {strides = array<i32>} : memref<32x32xf32, #tpu.memory_space<vmem>>, vector<32x32xf32>,
    %cst_47 = arith.constant dense<0.000000e+00> : vector<16x32xf32>
    %83 = tpu.matmul %21, %80, %cst_47 {dimension_numbers = #tpu.dot_dimension_numbers<[1], [0], [0], [1], [0, 0, 1, 1], [], []>, precision = #tpu.contract_precision<fp32>} : vector<16x32xf32>, vector<32x32xf32>, vector<16x32xf32> -> vector<16x32xf32>
    %c0_48 = arith.constant 0 : index
    %c0_49 = arith.constant 0 : index
    %c0_50 = arith.constant 0 : index
    %84 = vector.load %arg8[%c0_48, %c0_49, %c0_50] : memref<1x128x32xf32, #tpu.memory_space<vmem>>, vector<1x32x32xf32>
    %85 = vector.shape_cast %84 : vector<1x32x32xf32> to vector<32x32xf32>
    %cst_51 = arith.constant dense<0.000000e+00> : vector<16x32xf32>
    %86 = tpu.matmul %3, %85, %cst_51 {dimension_numbers = #tpu.dot_dimension_numbers<[1], [0], [0], [1], [0, 0, 1, 1], [], []>} : vector<16x32xf32>, vector<32x32xf32>, vector<16x32xf32> -> vector<16x32xf32>
    %c0_52 = arith.constant 0 : index
    %c32_53 = arith.constant 32 : index
    %c0_54 = arith.constant 0 : index
    %87 = vector.load %arg8[%c0_52, %c32_53, %c0_54] : memref<1x128x32xf32, #tpu.memory_space<vmem>>, vector<1x32x32xf32>
    %88 = vector.shape_cast %87 : vector<1x32x32xf32> to vector<32x32xf32>
    %cst_55 = arith.constant dense<0.000000e+00> : vector<16x32xf32>
    %89 = tpu.matmul %83, %88, %cst_55 {dimension_numbers = #tpu.dot_dimension_numbers<[1], [0], [0], [1], [0, 0, 1, 1], [], []>} : vector<16x32xf32>, vector<32x32xf32>, vector<16x32xf32> -> vector<16x32xf32>
    %90 = arith.addf %86, %89 : vector<16x32xf32>
    %c0_56 = arith.constant 0 : index
    %c0_57 = arith.constant 0 : index
    %c0_58 = arith.constant 0 : index
    %91 = vector.load %arg9[%c0_56, %c0_57, %c0_58] : memref<1x5x32xf32, #tpu.memory_space<vmem>>, vector<1x1x32xf32>
    %92 = vector.shape_cast %91 : vector<1x1x32xf32> to vector<1x32xf32>
    %93 = vector.broadcast %92 : vector<1x32xf32> to vector<16x32xf32>
    %94 = arith.addf %90, %93 : vector<16x32xf32>
    %cst_59 = arith.constant 0.000000e+00 : f32
    %95 = vector.broadcast %cst_59 : f32 to vector<16x32xf32>
    %96 = arith.maximumf %94, %95 : vector<16x32xf32>
    %c0_60 = arith.constant 0 : index
    %c64_61 = arith.constant 64 : index
    %c0_62 = arith.constant 0 : index
    %97 = vector.load %arg8[%c0_60, %c64_61, %c0_62] : memref<1x128x32xf32, #tpu.memory_space<vmem>>, vector<1x32x32xf32>
    %98 = vector.shape_cast %97 : vector<1x32x32xf32> to vector<32x32xf32>
    %cst_63 = arith.constant dense<0.000000e+00> : vector<16x32xf32>
    %99 = tpu.matmul %96, %98, %cst_63 {dimension_numbers = #tpu.dot_dimension_numbers<[1], [0], [0], [1], [0, 0, 1, 1], [], []>} : vector<16x32xf32>, vector<32x32xf32>, vector<16x32xf32> -> vector<16x32xf32>
    %c0_64 = arith.constant 0 : index
    %c1_65 = arith.constant 1 : index
    %c0_66 = arith.constant 0 : index
    %100 = vector.load %arg9[%c0_64, %c1_65, %c0_66] : memref<1x5x32xf32, #tpu.memory_space<vmem>>, vector<1x1x32xf32>
    %101 = vector.shape_cast %100 : vector<1x1x32xf32> to vector<1x32xf32>
    %102 = vector.broadcast %101 : vector<1x32xf32> to vector<16x32xf32>
    %103 = arith.addf %99, %102 : vector<16x32xf32>
    %cst_67 = arith.constant 0.000000e+00 : f32
    %104 = vector.broadcast %cst_67 : f32 to vector<16x32xf32>
    %105 = arith.maximumf %103, %104 : vector<16x32xf32>
    %c0_68 = arith.constant 0 : index
    %c96_69 = arith.constant 96 : index
    %c0_70 = arith.constant 0 : index
    %106 = vector.load %arg8[%c0_68, %c96_69, %c0_70] : memref<1x128x32xf32, #tpu.memory_space<vmem>>, vector<1x32x32xf32>
    %107 = vector.shape_cast %106 : vector<1x32x32xf32> to vector<32x32xf32>
    %cst_71 = arith.constant dense<0.000000e+00> : vector<16x32xf32>
    %108 = tpu.matmul %105, %107, %cst_71 {dimension_numbers = #tpu.dot_dimension_numbers<[1], [0], [0], [1], [0, 0, 1, 1], [], []>} : vector<16x32xf32>, vector<32x32xf32>, vector<16x32xf32> -> vector<16x32xf32>
    %c0_72 = arith.constant 0 : index
    %c2_73 = arith.constant 2 : index
    %c0_74 = arith.constant 0 : index
    %109 = vector.load %arg9[%c0_72, %c2_73, %c0_74] : memref<1x5x32xf32, #tpu.memory_space<vmem>>, vector<1x1x32xf32>
    %110 = vector.shape_cast %109 : vector<1x1x32xf32> to vector<1x32xf32>
    %111 = vector.broadcast %110 : vector<1x32xf32> to vector<16x32xf32>
    %112 = arith.addf %108, %111 : vector<16x32xf32>
    %c0_75 = arith.constant 0 : index
    %c3_76 = arith.constant 3 : index
    %c0_77 = arith.constant 0 : index
    %113 = vector.load %arg9[%c0_75, %c3_76, %c0_77] : memref<1x5x32xf32, #tpu.memory_space<vmem>>, vector<1x1x32xf32>
    %114 = vector.shape_cast %113 : vector<1x1x32xf32> to vector<1x32xf32>
    %c0_78 = arith.constant 0 : index
    %c4_79 = arith.constant 4 : index
    %c0_80 = arith.constant 0 : index
    %115 = vector.load %arg9[%c0_78, %c4_79, %c0_80] : memref<1x5x32xf32, #tpu.memory_space<vmem>>, vector<1x1x32xf32>
    %116 = vector.shape_cast %115 : vector<1x1x32xf32> to vector<1x32xf32>
    %cst_81 = arith.constant dense<0.000000e+00> : vector<16xf32>
    %117 = vector.multi_reduction <add>, %112, %cst_81 [1] : vector<16x32xf32> to vector<16xf32>
    %118 = vector.shape_cast %117 : vector<16xf32> to vector<16x1xf32>
    %cst_82 = arith.constant 3.200000e+01 : f32
    %119 = vector.broadcast %cst_82 : f32 to vector<16x1xf32>
    %120 = arith.divf %118, %119 : vector<16x1xf32>
    %121 = vector.broadcast %120 : vector<16x1xf32> to vector<16x32xf32>
    %122 = arith.subf %112, %121 : vector<16x32xf32>
    %123 = arith.mulf %122, %122 : vector<16x32xf32>
    %cst_83 = arith.constant dense<0.000000e+00> : vector<16xf32>
    %124 = vector.multi_reduction <add>, %123, %cst_83 [1] : vector<16x32xf32> to vector<16xf32>
    %125 = vector.shape_cast %124 : vector<16xf32> to vector<16x1xf32>
    %cst_84 = arith.constant 3.200000e+01 : f32
    %126 = vector.broadcast %cst_84 : f32 to vector<16x1xf32>
    %127 = arith.divf %125, %126 : vector<16x1xf32>
    %cst_85 = arith.constant 9.99999974E-6 : f32
    %128 = vector.broadcast %cst_85 : f32 to vector<16x1xf32>
    %129 = arith.addf %127, %128 : vector<16x1xf32>
    %130 = math.rsqrt %129 : vector<16x1xf32>
    %131 = vector.broadcast %130 : vector<16x1xf32> to vector<16x32xf32>
    %132 = arith.mulf %122, %131 : vector<16x32xf32>
    %133 = vector.broadcast %114 : vector<1x32xf32> to vector<16x32xf32>
    %134 = arith.mulf %132, %133 : vector<16x32xf32>
    %135 = vector.broadcast %116 : vector<1x32xf32> to vector<16x32xf32>
    %136 = arith.addf %134, %135 : vector<16x32xf32>
    %137 = arith.addf %3, %136 : vector<16x32xf32>
    %c0_86 = arith.constant 0 : index
    %c0_87 = arith.constant 0 : index
    %138 = vector.load %arg10[%c0_86, %c0_87] : memref<16x32xf32, #tpu.memory_space<vmem>>, vector<16x32xf32>
    tpu.vector_store %arg10[%c0_86, %c0_87], %137 {strides = array<i32>} : memref<16x32xf32, #tpu.memory_space<vmem>>, vector<16x32xf32>,
    return
  }
  func.func @transform_0(%arg0: i32) -> (i32, i32) {
    %c0_i32 = arith.constant 0 : i32
    %c0_i32_0 = arith.constant 0 : i32
    %c0_i32_1 = arith.constant 0 : i32
    return %c0_i32, %c0_i32_0 : i32, i32
  }
  func.func @transform_1(%arg0: i32) -> (i32, i32) {
    %c0_i32 = arith.constant 0 : i32
    %c0_i32_0 = arith.constant 0 : i32
    %c0_i32_1 = arith.constant 0 : i32
    return %c0_i32, %c0_i32_0 : i32, i32
  }
  func.func @transform_2(%arg0: i32) -> (i32, i32) {
    %c0_i32 = arith.constant 0 : i32
    %c0_i32_0 = arith.constant 0 : i32
    %c0_i32_1 = arith.constant 0 : i32
    return %c0_i32, %c0_i32_0 : i32, i32
  }
  func.func @transform_3(%arg0: i32) -> (i32, i32) {
    %c0_i32 = arith.constant 0 : i32
    %c0_i32_0 = arith.constant 0 : i32
    %c0_i32_1 = arith.constant 0 : i32
    return %c0_i32, %c0_i32_0 : i32, i32
  }
  func.func @transform_4(%arg0: i32) -> (i32, i32) {
    %c0_i32 = arith.constant 0 : i32
    %c0_i32_0 = arith.constant 0 : i32
    %c0_i32_1 = arith.constant 0 : i32
    return %c0_i32, %c0_i32_0 : i32, i32
  }
  func.func @transform_5(%arg0: i32) -> (i32, i32, i32) {
    %c0_i32 = arith.constant 0 : i32
    %c0_i32_0 = arith.constant 0 : i32
    %c0_i32_1 = arith.constant 0 : i32
    return %arg0, %c0_i32, %c0_i32_0 : i32, i32, i32
  }
  func.func @transform_6(%arg0: i32) -> (i32, i32, i32) {
    %c0_i32 = arith.constant 0 : i32
    %c0_i32_0 = arith.constant 0 : i32
    %c0_i32_1 = arith.constant 0 : i32
    return %arg0, %c0_i32, %c0_i32_0 : i32, i32, i32
  }
  func.func @transform_7(%arg0: i32) -> (i32, i32, i32) {
    %c0_i32 = arith.constant 0 : i32
    %c0_i32_0 = arith.constant 0 : i32
    %c0_i32_1 = arith.constant 0 : i32
    return %arg0, %c0_i32, %c0_i32_0 : i32, i32, i32
  }
  func.func @transform_8(%arg0: i32) -> (i32, i32, i32) {
    %c0_i32 = arith.constant 0 : i32
    %c0_i32_0 = arith.constant 0 : i32
    %c0_i32_1 = arith.constant 0 : i32
    return %arg0, %c0_i32, %c0_i32_0 : i32, i32, i32
  }
  func.func @transform_9(%arg0: i32) -> (i32, i32) {
    %c0_i32 = arith.constant 0 : i32
    %c0_i32_0 = arith.constant 0 : i32
    %c0_i32_1 = arith.constant 0 : i32
    return %c0_i32, %c0_i32_0 : i32, i32
  }
  func.func @transform_10(%arg0: i32) -> (i32, i32) {
    %c0_i32 = arith.constant 0 : i32
    %c0_i32_0 = arith.constant 0 : i32
    %c0_i32_1 = arith.constant 0 : i32
    return %c0_i32, %c0_i32_0 : i32, i32
  }
}

</mosaic_0001>

<bundles_post_ra>
// kernel: graphnet_forward.1
= control target key start
LH: loop header
LB: loop body
LE: loop exit
PB: predicated region body
PF: predicated region fallthrough
CT: control target
= control target key end

     0   :  { %16 = vsyncpa [#allocation3], 0  ;;  %s4809_s0 = inlined_call_operand.vmem [shape: s32[32,1], index: 0, kind: input, shape index: {}]   ;;  %s4810_s1 = inlined_call_operand.vmem [shape: s32[32,1], index: 1, kind: input, shape index: {}]   ;;  %s4811_s2 = inlined_call_operand.vmem [shape: s32[1,32], index: 2, kind: input, shape index: {}]   ;;  %s4812_s3 = inlined_call_operand.vmem [shape: f32[16,32], index: 3, kind: input, shape index: {}]   ;;  %s4813_s4 = inlined_call_operand.vmem [shape: f32[32,32], index: 4, kind: input, shape index: {}]   ;;  %s4814_s5 = inlined_call_operand.vmem [shape: f32[2,160,32], index: 5, kind: input, shape index: {}]   ;;  %s4815_s6 = inlined_call_operand.vmem [shape: f32[2,5,32], index: 6, kind: input, shape index: {}]   ;;  %s4816_s7 = inlined_call_operand.vmem [shape: f32[2,128,32], index: 7, kind: input, shape index: {}]   ;;  %s4817_s8 = inlined_call_operand.vmem [shape: f32[2,5,32], index: 8, kind: input, shape index: {}]   ;;  %s4818_s9 = inlined_call_operand.hbm [shape: f32[16,32], index: 9, kind: output, shape index: {0}]   ;;  %s4819_s10 = inlined_call_operand.hbm [shape: f32[32,32], index: 10, kind: output, shape index: {1}]  }
   0x1   :  { %17 = vsyncpa [#allocation5], 0  ;;  %s4326_s13 = smov 0  }
   0x2 LB: > { %s4332_s14 = sadd.s32 4294967295, %s4263_s13   ;;  %p3361_p0 = scmp.ge.s32.totalorder %s4263_s13, 1  ;;  %s4263_s13 = sphi %s4326_s13, %s23_s13  }
   0x3   : > { %p335_p1 = scmp.lt.s32.totalorder %s4263_s13, 3 }
   0x5   : > { %p336_p2 = pnand %p3361_p0, %p335_p1 }
   0x6   : > { %p381_p3 = scmp.lt.s32.totalorder (!%p336_p2), %s4332_s14, 1  ;;  %p3367_p4 = scmp.ne.s32.totalorder (!%p336_p2), %s4332_s14, 0 }
   0x7   : > { %339 = sbr.rel (%p336_p2) target bundleno = 2662 (0xa66), region = 56 }
   0xe   : > { %s382_s15 = scalar_select %p381_p3, %s4332_s14, 1 }
   0xf   : > { %402 = sbr.rel (%p3367_p4) target bundleno = 22 (0x16), region = 60  ;;  %v403_v0 = vld [vmem:[%s4812_s3] sm:$0xff] (!%p3367_p4)  ;;  %vm405_vm0 = vcmask (!%p3367_p4), 261120   ;;  %v404_v1 = vld [vmem:[%s4812_s3 + $0x8] sm:$0xff] (!%p3367_p4)  ;;  %v410_v4 = vld [vmem:[%s4813_s4 + $0x10] sm:$0xff] (!%p3367_p4) }
  0x10   : > { %s4154_s16 = smul.u32 160, %s382_s15  ;;  %s3363_s17 = sshll.u32 %s382_s15, 3  ;;  %v408_v2 = vld [vmem:[%s4813_s4] sm:$0xff] (!%p3367_p4)  ;;  %406 = vst.msk [vmem:[#allocation2] sm:$0xff] (!%p3367_p4), %vm405_vm0, %v403_v0  ;;  %407 = vst.msk [vmem:[#allocation2 + $0x8] sm:$0xff] (!%p3367_p4), %vm405_vm0, %v404_v1  ;;  %v409_v3 = vld [vmem:[%s4813_s4 + $0x8] sm:$0xff] (!%p3367_p4) }
  0x11   : > { %s4341_s20 = scalar_lea.vmem %s4815_s6, %s3363_s17  ;;  %s3453_s21 = sshll.u32 %s382_s15, 7  ;;  %412 = vst.msk [vmem:[#allocation4] sm:$0xff] (!%p3367_p4), %vm405_vm0, %v408_v2  ;;  %v411_v5 = vld [vmem:[%s4813_s4 + $0x18] sm:$0xff] (!%p3367_p4)  ;;  %413 = vst.msk [vmem:[#allocation4 + $0x8] sm:$0xff] (!%p3367_p4), %vm405_vm0, %v409_v3 }
  0x12   : > { %s4346_s24 = scalar_lea.vmem %s4814_s5, %s4154_s16  ;;  %s4351_s27 = scalar_lea.vmem %s4816_s7, %s3453_s21  ;;  %414 = vst.msk [vmem:[#allocation4 + $0x10] sm:$0xff] (!%p3367_p4), %vm405_vm0, %v410_v4  ;;  %415 = vst.msk [vmem:[#allocation4 + $0x18] sm:$0xff] (!%p3367_p4), %vm405_vm0, %v411_v5 }
  0x13   : > { %s4356_s30 = scalar_lea.vmem %s4817_s8, %s3363_s17 }
  0x16 PF: > { %v426_v6 = vld [vmem:[%s4809_s0 + $0x10] sm:$0xff]  ;;  %v424_v7 = vld [vmem:[%s4809_s0] sm:$0xff]  ;;  %v4265_v8 = vmov 0   ;;  %v427_v9 = vld [vmem:[%s4809_s0 + $0x18] sm:$0xff]  ;;  %v422_v31 = vlaneseq  ;;  %vm494_vm1 = vcmask 130048   ;;  %v4266_v35 = vmov 0.0  }
  0x17   : > { %4182 = vset.pattern.permute.xlu1 %v4265_v8  ;;  %4181 = vset.pattern.permute.xlu0 %v4265_v8  ;;  %v425_v10 = vld [vmem:[%s4809_s0 + $0x8] sm:$0xff]  ;;  %v452_v12 = vld [vmem:[%s4810_s1] sm:$0xff]  ;;  %v455_v17 = vld [vmem:[%s4810_s1 + $0x18] sm:$0xff]  ;;  %vm1703_vm10 = vcmask 261120   ;;  %p4163_p5 = scmp.eq.s32.totalorder %s4332_s14, 1 }
  0x18   : > { %435 = vperm.xlu1 %4182, %v426_v6   ;;  %429 = vperm.xlu0 %4181, %v424_v7   ;;  %v453_v11 = vld [vmem:[%s4810_s1 + $0x8] sm:$0xff]  ;;  %v4395_v13 = vld [vmem:[#allocation2] sm:$0xff]  ;;  %v454_v18 = vld [vmem:[%s4810_s1 + $0x10] sm:$0xff]  ;;  %v423_v32 = vand.u32 127, %v422_v31 }
  0x19   : > { %v4397_v14 = vld [vmem:[#allocation2 + $0x8] sm:$0xff]  ;;  %v508_v15 = vand.u32 4294901760, %v4395_v13 }
  0x1a   : > { %v511_v16 = vand.u32 4294901760, %v4397_v14 }
  0x1b   : > { %v616_v20 = vsub.f32 %v4395_v13, %v508_v15 }
  0x1c   : > { %438 = vperm.xlu1 %4182, %v427_v9   ;;  %432 = vperm.xlu0 %4181, %v425_v10   ;;  %v4407_v19 = vpack.c.bf16 %v511_v16, %v508_v15  ;;  %v623_v21 = vsub.f32 %v4397_v14, %v511_v16 }
  0x1d   : > { %v617_v22 = vand.u32 4294901760, %v616_v20 }
  0x1e   : > { %3927 = vmatprep.subr.bf16.mxu0 %v4407_v19  ;;  %v624_v23 = vand.u32 4294901760, %v623_v21  ;;  %3951 = vmatprep.subr.bf16.mxu1 %v4407_v19  ;;  %v4419_v29 = vpack.c.bf16 %v623_v21, %v616_v20 }
  0x1f   : > { %3929 = vmatpush3.bf16.msra.mxu0 %v4407_v19  ;;  %v618_v24 = vsub.f32 %v616_v20, %v617_v22  ;;  %3953 = vmatpush3.bf16.msra.mxu1 %v4407_v19 }
  0x20   : > { %460 = vperm.xlu1 %4182, %v453_v11   ;;  %457 = vperm.xlu0 %4181, %v452_v12   ;;  %v625_v25 = vsub.f32 %v623_v21, %v624_v23  ;;  %v4421_v30 = vpack.c.bf16 %v624_v23, %v617_v22 }
  0x21   : > { %v619_v26 = vand.u32 4294901760, %v618_v24 }
  0x22   : > { %v626_v27 = vand.u32 4294901760, %v625_v25 }
  0x24   : > { %466 = vperm.xlu1 %4182, %v455_v17   ;;  %463 = vperm.xlu0 %4181, %v454_v18   ;;  %v4415_v28 = vpack.c.bf16 %v626_v27, %v619_v26 }
  0x26   : > { %3931 = vmatprep.subr.bf16.mxu0 %v4415_v28  ;;  %3955 = vmatprep.subr.bf16.mxu1 %v4415_v28 }
  0x97   : > { %v436_v33 = vpop.permute.xlu1 %435  ;;  %v430_v34 = vpop.permute.xlu0 %429 }
  0x98   : > { %vm442_vm2 = vcmp.eq.s32.totalorder %v423_v32, %v436_v33  ;;  %vm440_vm3 = vcmp.eq.s32.totalorder %v423_v32, %v430_v34  ;;  %v1701_v34 = vld [vmem:[%s4346_s24 + $0x30] sm:$0xff] }
  0x99   : > { %v4425_v36 = vsel %vm442_vm2, 1.0, %v4266_v35  ;;  %v4428_v37 = vsel %vm440_vm3, 1.0, %v4266_v35 }
  0x9a   : > { %v502_v38 = vsel %vm494_vm1, %v4425_v36, 0  ;;  %v496_v39 = vsel %vm494_vm1, %v4428_v37, 0 }
  0x9b   : > { %v4434_v40 = vsub.f32 %v502_v38, %v502_v38  ;;  %v439_v41 = vpop.permute.xlu1 %438  ;;  %v433_v42 = vpop.permute.xlu0 %432  ;;  %v4436_v43 = vsub.f32 %v496_v39, %v496_v39  ;;  %v1702_v38 = vld [vmem:[%s4346_s24 + $0x38] sm:$0xff]  ;;  %v2016_v39 = vld [vmem:[%s4346_s24 + $0x60] sm:$0xff] }
  0x9c   : > { %vm443_vm4 = vcmp.eq.s32.totalorder %v423_v32, %v439_v41  ;;  %vm441_vm5 = vcmp.eq.s32.totalorder %v423_v32, %v433_v42  ;;  %v1697_v42 = vld [vmem:[%s4346_s24 + $0x10] sm:$0xff] }
  0x9d   : > { %v4439_v44 = vsel %vm443_vm4, 1.0, %v4266_v35  ;;  %v4442_v45 = vsel %vm441_vm5, 1.0, %v4266_v35  ;;  %v576_v46 = vand.u32 4294901760, %v4436_v43  ;;  %v596_v49 = vand.u32 4294901760, %v4434_v40 }
  0x9e   : > { %v505_v47 = vsel %vm494_vm1, %v4439_v44, 0  ;;  %v499_v48 = vsel %vm494_vm1, %v4442_v45, 0 }
  0x9f   : > { %v4450_v50 = vsub.f32 %v505_v47, %v505_v47  ;;  %v4452_v51 = vsub.f32 %v499_v48, %v499_v48  ;;  %v461_v52 = vpop.permute.xlu1 %460  ;;  %v458_v53 = vpop.permute.xlu0 %457  ;;  %v577_v54 = vsub.f32 %v4436_v43, %v576_v46  ;;  %v597_v60 = vsub.f32 %v4434_v40, %v596_v49  ;;  %v1898_v47 = vld [vmem:[%s4346_s24 + $0x40] sm:$0xff]  ;;  %v1899_v48 = vld [vmem:[%s4346_s24 + $0x48] sm:$0xff] }
  0xa0   : > { %vm469_vm6 = vcmp.eq.s32.totalorder %v423_v32, %v461_v52  ;;  %vm468_vm7 = vcmp.eq.s32.totalorder %v423_v32, %v458_v53  ;;  %v1900_v53 = vld [vmem:[%s4346_s24 + $0x50] sm:$0xff] }
  0xa1   : > { %v4458_v55 = vsel %vm469_vm6, 1.0, %v4266_v35  ;;  %v4461_v56 = vsel %vm468_vm7, 1.0, %v4266_v35  ;;  %v578_v57 = vand.u32 4294901760, %v577_v54  ;;  %v586_v58 = vand.u32 4294901760, %v4452_v51  ;;  %v1901_v54 = vld [vmem:[%s4346_s24 + $0x58] sm:$0xff] }
  0xa2   : > { %v1099_v59 = vsel %vm494_vm1, %v4458_v55, 0  ;;  %v606_v61 = vand.u32 4294901760, %v4450_v50  ;;  %v1096_v62 = vsel %vm494_vm1, %v4461_v56, 0  ;;  %v598_v11 = vand.u32 4294901760, %v597_v60  ;;  %v4607_v60 = vld [vmem:[#allocation4 + $0x8] sm:$0xff] }
  0xa3   : > { %v4472_v63 = vsub.f32 %v1099_v59, %v1099_v59  ;;  %v467_v0 = vpop.permute.xlu1 %466  ;;  %v464_v1 = vpop.permute.xlu0 %463  ;;  %3630 = vmatprep.mubr.f32.mxu0 %v578_v57  ;;  %v587_v2 = vsub.f32 %v4452_v51, %v586_v58  ;;  %v4477_v3 = vsub.f32 %v1096_v62, %v1096_v62  ;;  %v4602_v59 = vld [vmem:[#allocation4] sm:$0xff]  ;;  %v4615_v62 = vld [vmem:[#allocation4 + $0x18] sm:$0xff] }
  0xa4   : > { %vm471_vm8 = vcmp.eq.s32.totalorder %v423_v32, %v467_v0  ;;  %vm470_vm9 = vcmp.eq.s32.totalorder %v423_v32, %v464_v1  ;;  %v607_v4 = vsub.f32 %v4450_v50, %v606_v61  ;;  %v2019_v0 = vld [vmem:[%s4346_s24 + $0x78] sm:$0xff] }
  0xa5   : > { %v4483_v5 = vsel %vm471_vm8, 1.0, %v4266_v35  ;;  %v4486_v6 = vsel %vm470_vm9, 1.0, %v4266_v35  ;;  %v588_v7 = vand.u32 4294901760, %v587_v2  ;;  %v1176_v8 = vand.u32 4294901760, %v4477_v3  ;;  %v2126_v2 = vld [vmem:[%s4346_s24 + $0x80] sm:$0xff] }
  0xa6   : > { %v1105_v9 = vsel %vm494_vm1, %v4483_v5, 0  ;;  %v1102_v10 = vsel %vm494_vm1, %v4486_v6, 0  ;;  %v1186_v12 = vand.u32 4294901760, %v4472_v63  ;;  %v608_v20 = vand.u32 4294901760, %v607_v4 }
  0xa7   : > { %v4494_v15 = vsub.f32 %v1105_v9, %v1105_v9  ;;  %v1195_v16 = vsub.f32 %v1102_v10, %v1102_v10  ;;  %3631 = vmatmul.mubr.f32.vlgmr.msra.gmra.mrb[0].mxu0 %v588_v7  ;;  %v1177_v17 = vsub.f32 %v4477_v3, %v1176_v8 }
  0xa8   : > { %3633 = vmatprep.mubr.f32.mxu0 %v598_v11  ;;  %3933 = vmatpush3.bf16.msra.mxu0 %v4415_v28  ;;  %v1187_v18 = vsub.f32 %v4472_v63, %v1186_v12 }
  0xa9   : > { %v1178_v21 = vand.u32 4294901760, %v1177_v17  ;;  %3935 = vmatprep.subr.bf16.mxu0 %v4419_v29  ;;  %v1196_v22 = vand.u32 4294901760, %v1195_v16  ;;  %v1206_v23 = vand.u32 4294901760, %v4494_v15 }
  0xaa   : > { %v1188_v24 = vand.u32 4294901760, %v1187_v18 }
  0xab   : > { %3634 = vmatmul.mubr.f32.gmra.mrb[2].mxu0 %v608_v20  ;;  %3690 = vmatprep.mubr.f32.mxu1 %v1178_v21  ;;  %v1197_v25 = vsub.f32 %v1195_v16, %v1196_v22  ;;  %v1207_v26 = vsub.f32 %v4494_v15, %v1206_v23  ;;  %v2128_v21 = vld [vmem:[%s4346_s24 + $0x90] sm:$0xff] }
  0xac   : > { %3640 = vmatprep.mubr.msk.f32.mxu0 %vm494_vm1, %v4428_v37  ;;  %3691 = vmatmul.mubr.f32.vlgmr.msra.gmra.mrb[0].mxu1 %v1188_v24  ;;  %v3416_v24 = vld [vmem:[%s4341_s20 + $0x1] ss:$0 sm:$0xff] }
  0xad   : > { %v1198_v27 = vand.u32 4294901760, %v1197_v25  ;;  %v1208_v32 = vand.u32 4294901760, %v1207_v26  ;;  %3957 = vmatpush3.bf16.msra.mxu1 %v4415_v28  ;;  %v1699_v28 = vld [vmem:[%s4346_s24 + $0x20] sm:$0xff] }
  0xae   : > { %3959 = vmatprep.subr.bf16.mxu1 %v4419_v29 }
  0xaf   : > { %3641 = vmatmul.mubr.msk.f32.vlgmr.msra.gmra.mrb[0].mxu0 %vm494_vm1, %v4442_v45  ;;  %3693 = vmatprep.mubr.f32.mxu1 %v1198_v27 }
  0xb0   : > { %3643 = vmatprep.mubr.msk.f32.mxu0 %vm494_vm1, %v4425_v36  ;;  %3937 = vmatpush3.bf16.msra.mxu0 %v4419_v29 }
  0xb1   : > { %3694 = vmatmul.mubr.f32.gmra.mrb[2].mxu1 %v1208_v32  ;;  %3939 = vmatprep.subr.bf16.mxu0 %v4407_v19 }
  0xb2   : > { %3700 = vmatprep.mubr.msk.f32.mxu1 %vm494_vm1, %v4461_v56 }
  0xb3   : > { %3644 = vmatmul.mubr.msk.f32.gmra.mrb[2].mxu0 %vm494_vm1, %v4439_v44 }
  0xb4   : > { %3650 = vmatprep.mubr.f32.mxu0 %v4436_v43  ;;  %v1698_v43 = vld [vmem:[%s4346_s24 + $0x18] sm:$0xff] }
  0xb5   : > { %3701 = vmatmul.mubr.msk.f32.vlgmr.msra.gmra.mrb[0].mxu1 %vm494_vm1, %v4458_v55 }
  0xb6   : > { %3703 = vmatprep.mubr.msk.f32.mxu1 %vm494_vm1, %v4486_v6  ;;  %3961 = vmatpush3.bf16.msra.mxu1 %v4419_v29  ;;  %v1700_v29 = vld [vmem:[%s4346_s24 + $0x28] sm:$0xff] }
  0xb7   : > { %3651 = vmatmul.mubr.f32.vlgmr.msra.gmra.mrb[0].mxu0 %v4452_v51  ;;  %3963 = vmatprep.subr.bf16.mxu1 %v4407_v19  ;;  %v3974_v33 = vpack.c.bf16 %v1700_v29, %v1699_v28  ;;  %v3990_v51 = vpack.c.bf16 %v1899_v48, %v1898_v47 }
  0xb8   : > { %3653 = vmatprep.mubr.f32.mxu0 %v4434_v40  ;;  %3941 = vmatpush3.bf16.msra.mxu0 %v4407_v19  ;;  %v2017_v40 = vld [vmem:[%s4346_s24 + $0x68] sm:$0xff] }
  0xb9   : > { %3704 = vmatmul.mubr.msk.f32.gmra.mrb[2].mxu1 %vm494_vm1, %v4483_v5  ;;  %3943 = vmatprep.subr.bf16.mxu0 %v4421_v30  ;;  %v3998_v41 = vpack.c.bf16 %v2017_v40, %v2016_v39 }
  0xba   : > { %3710 = vmatprep.mubr.f32.mxu1 %v4477_v3  ;;  %v2127_v3 = vld [vmem:[%s4346_s24 + $0x88] sm:$0xff] }
  0xbb   : > { %3654 = vmatmul.mubr.f32.gmra.mrb[2].mxu0 %v4450_v50  ;;  %v4006_v4 = vpack.c.bf16 %v2127_v3, %v2126_v2 }
  0xbc   : > { %3660 = vmatprep.mubr.f32.mxu0 %v576_v46  ;;  %v3986_v46 = vpack.c.bf16 %v1698_v43, %v1697_v42 }
  0xbd   : > { %3711 = vmatmul.mubr.f32.vlgmr.msra.gmra.mrb[0].mxu1 %v4472_v63  ;;  %v2018_v63 = vld [vmem:[%s4346_s24 + $0x70] sm:$0xff] }
  0xbe   : > { %3713 = vmatprep.mubr.f32.mxu1 %v1195_v16  ;;  %3965 = vmatpush3.bf16.msra.mxu1 %v4407_v19  ;;  %v4002_v1 = vpack.c.bf16 %v2019_v0, %v2018_v63 }
  0xbf   : > { %3661 = vmatmul.mubr.f32.vlgmr.msra.gmra.mrb[0].mxu0 %v586_v58  ;;  %3967 = vmatprep.subr.bf16.mxu1 %v4421_v30 }
  0xc0   : > { %3663 = vmatprep.mubr.f32.mxu0 %v596_v49  ;;  %3945 = vmatpush3.bf16.msra.mxu0 %v4421_v30 }
  0xc1   : > { %3714 = vmatmul.mubr.f32.gmra.mrb[2].mxu1 %v4494_v15  ;;  %3947 = vmatprep.subr.bf16.mxu0 %v4407_v19 }
  0xc2   : > { %3720 = vmatprep.mubr.f32.mxu1 %v1176_v8 }
  0xc3   : > { %3664 = vmatmul.mubr.f32.gmra.mrb[2].mxu0 %v606_v61  ;;  %v4609_v61 = vld [vmem:[#allocation4 + $0x10] sm:$0xff] }
  0xc4   : > { %3670 = vmatprep.mubr.msk.f32.mxu0 %vm494_vm1, %v4428_v37 }
  0xc5   : > { %3721 = vmatmul.mubr.f32.vlgmr.msra.gmra.mrb[0].mxu1 %v1186_v12 }
  0xc6   : > { %3723 = vmatprep.mubr.f32.mxu1 %v1196_v22  ;;  %3969 = vmatpush3.bf16.msra.mxu1 %v4421_v30  ;;  %v3978_v30 = vpack.c.bf16 %v1702_v38, %v1701_v34  ;;  %v2129_v22 = vld [vmem:[%s4346_s24 + $0x98] sm:$0xff] }
  0xc7   : > { %3671 = vmatmul.mubr.msk.f32.vlgmr.msra.gmra.mrb[0].mxu0 %vm494_vm1, %v4442_v45  ;;  %3971 = vmatprep.subr.bf16.mxu1 %v4407_v19 }
  0xc8   : > { %3673 = vmatprep.mubr.msk.f32.mxu0 %vm494_vm1, %v4425_v36  ;;  %3949 = vmatpush3.bf16.msra.mxu0 %v4407_v19 }
  0xc9   : > { %3724 = vmatmul.mubr.f32.gmra.mrb[2].mxu1 %v1206_v23  ;;  %3975 = vmatprep.subr.bf16.mxu0 %v3974_v33  ;;  %v4010_v23 = vpack.c.bf16 %v2129_v22, %v2128_v21  ;;  %v2849_v22 = vld [vmem:[%s4351_s27 + $0x20] sm:$0xff] }
  0xca   : > { %3730 = vmatprep.mubr.msk.f32.mxu1 %vm494_vm1, %v4461_v56 }
  0xcb   : > { %3674 = vmatmul.mubr.msk.f32.gmra.mrb[2].mxu0 %vm494_vm1, %v4439_v44 }
  0xcc   : > { %3680 = vmatprep.mubr.msk.f32.mxu0 %vm494_vm1, %v4428_v37 }
  0xcd   : > { %3731 = vmatmul.mubr.msk.f32.vlgmr.msra.gmra.mrb[0].mxu1 %vm494_vm1, %v4458_v55 }
  0xce   : > { %3733 = vmatprep.mubr.msk.f32.mxu1 %vm494_vm1, %v4486_v6  ;;  %3973 = vmatpush3.bf16.msra.mxu1 %v4407_v19  ;;  %v1695_v19 = vld [vmem:[%s4346_s24] sm:$0xff] }
  0xcf   : > { %3681 = vmatmul.mubr.msk.f32.vlgmr.msra.gmra.mrb[0].mxu0 %vm494_vm1, %v4442_v45  ;;  %3999 = vmatprep.subr.bf16.mxu1 %v3998_v41 }
  0xd0   : > { %3683 = vmatprep.mubr.msk.f32.mxu0 %vm494_vm1, %v4425_v36  ;;  %3977 = vmatpush3.bf16.msra.mxu0 %v3974_v33  ;;  %v1696_v36 = vld [vmem:[%s4346_s24 + $0x8] sm:$0xff] }
  0xd1   : > { %3734 = vmatmul.mubr.msk.f32.gmra.mrb[2].mxu1 %vm494_vm1, %v4483_v5  ;;  %3979 = vmatprep.subr.bf16.mxu0 %v3978_v30  ;;  %v3982_v37 = vpack.c.bf16 %v1696_v36, %v1695_v19 }
  0xd2   : > { %3740 = vmatprep.mubr.msk.f32.mxu1 %vm494_vm1, %v4461_v56  ;;  %v3994_v56 = vpack.c.bf16 %v1901_v54, %v1900_v53 }
  0xd3   : > { %3684 = vmatmul.mubr.msk.f32.gmra.mrb[2].mxu0 %vm494_vm1, %v4439_v44 }
  0xd4   : > { %3981 = vmatpush3.bf16.msra.mxu0 %v3978_v30 }
  0xd5   : > { %3741 = vmatmul.mubr.msk.f32.vlgmr.msra.gmra.mrb[0].mxu1 %vm494_vm1, %v4458_v55  ;;  %3983 = vmatprep.subr.bf16.mxu0 %v3982_v37 }
  0xd6   : > { %3743 = vmatprep.mubr.msk.f32.mxu1 %vm494_vm1, %v4486_v6  ;;  %4001 = vmatpush3.bf16.msra.mxu1 %v3998_v41 }
  0xd7   : > { %4003 = vmatprep.subr.bf16.mxu1 %v4002_v1 }
  0xd9   : > { %3744 = vmatmul.mubr.msk.f32.gmra.mrb[2].mxu1 %vm494_vm1, %v4483_v5  ;;  %v3415_v5 = vld [vmem:[%s4341_s20] ss:$0 sm:$0xff] }
  0xda   : > { %4005 = vmatpush3.bf16.msra.mxu1 %v4002_v1 }
  0xdb   : > { %4007 = vmatprep.subr.bf16.mxu1 %v4006_v4 }
 0x1a2   : > { %v3682_v44 = vpop.f32.mrb[0].mxu0 }
 0x1a3   : > { %v1073_v45 = vpop.f32.mrb[1].mxu0 }
 0x1a4   : > { %3754 = vmatprep.mubr.msk.f32.mxu0 %vm1703_vm10, %v1073_v45 }
 0x1a5   : > { %3755 = vmatmul.mubr.msk.f32.vlgmr.msra.gmra.mrb[4].mxu0 %vm1703_vm10, %v3682_v44 }
 0x1a6   : > { %v3685_v49 = vpop.f32.mrb[2].mxu0  ;;  %3985 = vmatpush3.bf16.msra.mxu0 %v3982_v37  ;;  %v3421_v37 = vld [vmem:[%s4341_s20 + $0x2] ss:$0 sm:$0xff] }
 0x1a7   : > { %v1085_v50 = vpop.f32.mrb[3].mxu0  ;;  %3987 = vmatprep.subr.bf16.mxu0 %v3986_v46 }
 0x1a8   : > { %v3742_v52 = vpop.f32.mrb[0].mxu1  ;;  %3757 = vmatprep.mubr.msk.f32.mxu0 %vm1703_vm10, %v1085_v50 }
 0x1a9   : > { %v1673_v55 = vpop.f32.mrb[1].mxu1  ;;  %3758 = vmatmul.mubr.msk.f32.gmra.mrb[6].mxu0 %vm1703_vm10, %v3685_v49 }
 0x1aa   : > { %3989 = vmatpush3.bf16.msra.mxu0 %v3986_v46  ;;  %3768 = vmatprep.mubr.msk.f32.mxu0 %vm1703_vm10, %v1673_v55 }
 0x1ab   : > { %3991 = vmatprep.subr.bf16.mxu0 %v3990_v51 }
 0x1ac   : > { %v3745_v57 = vpop.f32.mrb[2].mxu1 }
 0x1ad   : > { %v1685_v58 = vpop.f32.mrb[3].mxu1  ;;  %3769 = vmatmul.mubr.msk.f32.vlgmr.msra.gmra.mrb[4].mxu0 %vm1703_vm10, %v3742_v52 }
 0x1ae   : > { %3771 = vmatprep.mubr.msk.f32.mxu0 %vm1703_vm10, %v1685_v58  ;;  %3993 = vmatpush3.bf16.msra.mxu0 %v3990_v51 }
 0x1af   : > { %3995 = vmatprep.subr.bf16.mxu0 %v3994_v56 }
 0x1b1   : > { %3772 = vmatmul.mubr.msk.f32.gmra.mrb[6].mxu0 %vm1703_vm10, %v3745_v57 }
 0x1b2   : > { %3997 = vmatpush3.bf16.msra.mxu0 %v3994_v56  ;;  %3782 = vmatprep.mubr.msk.f32.mxu0 %vm1703_vm10, %v4602_v59 }
 0x1b5   : > { %3783 = vmatmul.mubr.msk.f32.vlgmr.msra.gmra.mrb[4].mxu0 %vm1703_vm10, %v4607_v60 }
 0x1b6   : > { %3785 = vmatprep.mubr.msk.f32.mxu0 %vm1703_vm10, %v4609_v61 }
 0x1b9   : > { %3786 = vmatmul.mubr.msk.f32.gmra.mrb[6].mxu0 %vm1703_vm10, %v4615_v62 }
 0x288   : > { %v3784_v6 = vpop.f32.mrb[4].mxu0 }
 0x289   : > { %v2009_v7 = vadd.f32 %v3784_v6, %v3415_v5  ;;  %v1980_v8 = vpop.f32.mrb[5].mxu0 }
 0x28a   : > { %v2008_v9 = vadd.f32 %v3415_v5, %v1980_v8 }
 0x28b   : > { %v2013_v12 = vmax.f32 %v2009_v7, 0.0 }
 0x28c   : > { %v2012_v10 = vmax.f32 %v2008_v9, 0.0  ;;  %v3787_v11 = vpop.f32.mrb[6].mxu0 }
 0x28d   : > { %v2011_v15 = vadd.f32 %v3787_v11, %v3415_v5  ;;  %v1990_v16 = vpop.f32.mrb[7].mxu0  ;;  %v481_v11 = vshrl.u32 %v422_v31, 7 }
 0x28e   : > { %v2010_v17 = vadd.f32 %v3415_v5, %v1990_v16  ;;  %3796 = vmatprep.mubr.msk.f32.mxu1 %vm1703_vm10, %v2012_v10 }
 0x28f   : > { %3797 = vmatmul.mubr.msk.f32.vlgmr.msra.gmra.mrb[4].mxu1 %vm1703_vm10, %v2013_v12  ;;  %v2015_v20 = vmax.f32 %v2011_v15, 0.0  ;;  %v482_v12 = vadd.s32 8, %v481_v11  ;;  %v3376_v15 = vld [vmem:[%s4811_s2] ss:$0 sm:$0xff] }
 0x290   : > { %v2014_v18 = vmax.f32 %v2010_v17, 0.0  ;;  %4009 = vmatpush3.bf16.msra.mxu1 %v4006_v4  ;;  %vm488_vm11 = vcmp.eq.s32.totalorder %v481_v11, %v3376_v15 }
 0x291   : > { %4011 = vmatprep.subr.bf16.mxu1 %v4010_v23  ;;  %vm489_vm12 = vcmp.eq.s32.totalorder %v482_v12, %v3376_v15  ;;  %v4661_v16 = vsel %vm488_vm11, 1.0, %v4266_v35 }
 0x292   : > { %3799 = vmatprep.mubr.msk.f32.mxu1 %vm1703_vm10, %v2014_v18  ;;  %v2312_v17 = vsel %vm1703_vm10, %v4661_v16, 0 }
 0x293   : > { %3800 = vmatmul.mubr.msk.f32.gmra.mrb[6].mxu1 %vm1703_vm10, %v2015_v20  ;;  %v4665_v18 = vsub.f32 %v2312_v17, %v2312_v17 }
 0x294   : > { %4013 = vmatpush3.bf16.msra.mxu1 %v4010_v23  ;;  %v2850_v23 = vld [vmem:[%s4351_s27 + $0x28] sm:$0xff] }
 0x295   : > { %v2388_v20 = vand.u32 4294901760, %v4665_v18 }
 0x297   : > { %v2389_v31 = vsub.f32 %v4665_v18, %v2388_v20 }
 0x299   : > { %v2390_v21 = vand.u32 4294901760, %v2389_v31 }
 0x362   : > { %v3798_v25 = vpop.f32.mrb[4].mxu1 }
 0x363   : > { %v2109_v26 = vadd.f32 %v3798_v25, %v3416_v24  ;;  %v2103_v27 = vpop.f32.mrb[5].mxu1  ;;  %v4062_v25 = vpack.c.bf16 %v2850_v23, %v2849_v22 }
 0x364   : > { %v2104_v32 = vadd.f32 %v3416_v24, %v2103_v27 }
 0x365   : > { %v2123_v33 = vmax.f32 %v2109_v26, 0.0  ;;  %v2852_v26 = vld [vmem:[%s4351_s27 + $0x38] sm:$0xff]  ;;  %4063 = vmatprep.subr.bf16.mxu0 %v4062_v25 }
 0x366   : > { %v2122_v28 = vmax.f32 %v2104_v32, 0.0  ;;  %v3801_v29 = vpop.f32.mrb[6].mxu1  ;;  %4065 = vmatpush3.bf16.msra.mxu0 %v4062_v25 }
 0x367   : > { %v2119_v34 = vadd.f32 %v3801_v29, %v3416_v24  ;;  %v2113_v38 = vpop.f32.mrb[7].mxu1 }
 0x368   : > { %v2114_v30 = vadd.f32 %v3416_v24, %v2113_v38  ;;  %3810 = vmatprep.mubr.msk.f32.mxu1 %vm1703_vm10, %v2122_v28  ;;  %v2851_v24 = vld [vmem:[%s4351_s27 + $0x30] sm:$0xff] }
 0x369   : > { %3811 = vmatmul.mubr.msk.f32.vlgmr.msra.gmra.mrb[8].mxu1 %vm1703_vm10, %v2123_v33  ;;  %v2125_v36 = vmax.f32 %v2119_v34, 0.0  ;;  %v4066_v27 = vpack.c.bf16 %v2852_v26, %v2851_v24 }
 0x36a   : > { %v2124_v19 = vmax.f32 %v2114_v30, 0.0 }
 0x36b   : > { %4067 = vmatprep.subr.bf16.mxu0 %v4066_v27 }
 0x36c   : > { %3813 = vmatprep.mubr.msk.f32.mxu1 %vm1703_vm10, %v2124_v19  ;;  %4069 = vmatpush3.bf16.msra.mxu0 %v4066_v27 }
 0x36d   : > { %3814 = vmatmul.mubr.msk.f32.gmra.mrb[10].mxu1 %vm1703_vm10, %v2125_v36 }
 0x36e   : > { %3824 = vmatprep.mubr.f32.mxu1 %v2390_v21 }
 0x43c   : > { %v3812_v39 = vpop.f32.mrb[8].mxu1 }
 0x43d   : > { %v2219_v40 = vadd.f32 %v3812_v39, %v3421_v37  ;;  %v2213_v41 = vpop.f32.mrb[9].mxu1 }
 0x43e   : > { %v2214_v42 = vadd.f32 %v3421_v37, %v2213_v41 }
 0x43f   : > { %v2237_v43 = vsel %vm1703_vm10, %v2219_v40, 0.0 }
 0x440   : > { %2238 = vadd.xlane.f32.xlu1 %v2237_v43  ;;  %v3815_v44 = vpop.f32.mrb[10].mxu1  ;;  %v2234_v45 = vsel %vm1703_vm10, %v2214_v42, 0.0 }
 0x441   : > { %2235 = vadd.xlane.f32.xlu0 %v2234_v45  ;;  %v2223_v46 = vpop.f32.mrb[11].mxu1  ;;  %v2229_v48 = vadd.f32 %v3815_v44, %v3421_v37  ;;  %v4678_v45 = vsel %vm489_vm12, 1.0, %v4266_v35 }
 0x442   : > { %v2224_v47 = vadd.f32 %v3421_v37, %v2223_v46  ;;  %v3427_v46 = vld [vmem:[%s4341_s20 + $0x4] ss:$0 sm:$0xff] }
 0x443   : > { %v2243_v50 = vsel %vm1703_vm10, %v2229_v48, 0.0 }
 0x444   : > { %v2240_v49 = vsel %vm1703_vm10, %v2224_v47, 0.0 }
 0x445   : > { %2241 = vadd.xlane.f32.xlu0 %v2240_v49 }
 0x449   : > { %2244 = vadd.xlane.f32.xlu0 %v2243_v50  ;;  %v2315_v50 = vsel %vm1703_vm10, %v4678_v45, 0 }
 0x4cd   : > { %v2239_v51 = vpop.xlane.xlu1 %2238 }
 0x4ce   : > { %v2248_v52 = vmul.f32 0.03125, %v2239_v51  ;;  %v2236_v53 = vpop.xlane.xlu0 %2235 }
 0x4cf   : > { %v2247_v54 = vmul.f32 0.03125, %v2236_v53 }
 0x4d0   : > { %v2252_v55 = vsub.f32 %v2219_v40, %v2248_v52 }
 0x4d1   : > { %v4640_v56 = vsub.f32 %v2214_v42, %v2247_v54  ;;  %v3426_v42 = vld [vmem:[%s4341_s20 + $0x3] ss:$0 sm:$0xff]  ;;  %s4267_s20 = smov [#allocation4]  }
 0x4d2   : > { %v2242_v57 = vpop.xlane.xlu0 %2241  ;;  %v2256_v58 = vmul.f32 %v2252_v55, %v2252_v55 }
 0x4d3   : > { %v2249_v63 = vmul.f32 0.03125, %v2242_v57  ;;  %v2255_v0 = vmul.f32 %v4640_v56, %v4640_v56 }
 0x4d4   : > { %v2262_v1 = vsel %vm1703_vm10, %v2256_v58, 0.0  ;;  %v4685_v58 = vsub.f32 %v2315_v50, %v2315_v50  ;;  %v3117_v50 = vld [vmem:[%s4351_s27 + $0x68] sm:$0xff] }
 0x4d5   : > { %v4645_v2 = vsub.f32 %v2224_v47, %v2249_v63  ;;  %2263 = vadd.xlane.f32.xlu0 %v2262_v1  ;;  %v2259_v3 = vsel %vm1703_vm10, %v2255_v0, 0.0 }
 0x4d6   : > { %2260 = vadd.xlane.f32.xlu1 %v2259_v3  ;;  %v2245_v4 = vpop.xlane.xlu0 %2244 }
 0x4d7   : > { %v2250_v5 = vmul.f32 0.03125, %v2245_v4  ;;  %v2257_v6 = vmul.f32 %v4645_v2, %v4645_v2 }
 0x4d9   : > { %v4650_v7 = vsub.f32 %v2229_v48, %v2250_v5  ;;  %v2265_v8 = vsel %vm1703_vm10, %v2257_v6, 0.0 }
 0x4da   : > { %2266 = vadd.xlane.f32.xlu1 %v2265_v8  ;;  %v2398_v8 = vand.u32 4294901760, %v4685_v58 }
 0x4db   : > { %v2258_v9 = vmul.f32 %v4650_v7, %v4650_v7 }
 0x4dc   : > { %v2399_v31 = vsub.f32 %v4685_v58, %v2398_v8 }
 0x4dd   : > { %v2268_v10 = vsel %vm1703_vm10, %v2258_v9, 0.0 }
 0x4de   : > { %2269 = vadd.xlane.f32.xlu0 %v2268_v10 }
 0x562   : > { %v2264_v32 = vpop.xlane.xlu0 %2263 }
 0x563   : > { %v2272_v28 = vmul.f32 0.03125, %v2264_v32  ;;  %v2261_v29 = vpop.xlane.xlu1 %2260 }
 0x564   : > { %v2271_v33 = vmul.f32 0.03125, %v2261_v29 }
 0x565   : > { %v2276_v34 = vadd.f32 1e-05, %v2272_v28 }
 0x566   : > { %v2275_v38 = vadd.f32 1e-05, %v2271_v33 }
 0x567   : > { %4183 = vrsqrt.f32 %v2276_v34  ;;  %v2267_v30 = vpop.xlane.xlu1 %2266 }
 0x568   : > { %4185 = vrsqrt.f32 %v2275_v38  ;;  %v2273_v19 = vmul.f32 0.03125, %v2267_v30 }
 0x56a   : > { %v2277_v36 = vadd.f32 1e-05, %v2273_v19 }
 0x56b   : > { %v2270_v37 = vpop.xlane.xlu0 %2269 }
 0x56c   : > { %4187 = vrsqrt.f32 %v2277_v36  ;;  %v2274_v39 = vmul.f32 0.03125, %v2270_v37 }
 0x56e   : > { %v2278_v40 = vadd.f32 1e-05, %v2274_v39  ;;  %v2847_v39 = vld [vmem:[%s4351_s27 + $0x10] sm:$0xff] }
 0x570   : > { %4189 = vrsqrt.f32 %v2278_v40  ;;  %v2848_v40 = vld [vmem:[%s4351_s27 + $0x18] sm:$0xff] }
 0x571   : > { %v4184_v41 = vpop.eup %4183 }
 0x572   : > { %v4186_v43 = vpop.eup %4185  ;;  %v2284_v44 = vmul.f32 %v4184_v41, %v2252_v55 }
 0x573   : > { %v2283_v47 = vmul.f32 %v4186_v43, %v4640_v56  ;;  %v4074_v43 = vpack.c.bf16 %v2848_v40, %v2847_v39 }
 0x574   : > { %v2292_v48 = vmul.f32 %v3426_v42, %v2284_v44  ;;  %v3024_v44 = vld [vmem:[%s4351_s27 + $0x40] sm:$0xff] }
 0x575   : > { %v2291_v49 = vmul.f32 %v3426_v42, %v2283_v47  ;;  %v3027_v47 = vld [vmem:[%s4351_s27 + $0x58] sm:$0xff] }
 0x576   : > { %v4188_v51 = vpop.eup %4187  ;;  %v2300_v52 = vadd.f32 %v3427_v46, %v2292_v48 }
 0x577   : > { %v2299_v53 = vadd.f32 %v3427_v46, %v2291_v49  ;;  %v2285_v54 = vmul.f32 %v4188_v51, %v4645_v2  ;;  %v3116_v49 = vld [vmem:[%s4351_s27 + $0x60] sm:$0xff] }
 0x578   : > { %v2321_v57 = vand.u32 4294901760, %v2300_v52  ;;  %v2304_v55 = vadd.f32 %v2300_v52, %v4607_v60  ;;  %v4086_v51 = vpack.c.bf16 %v3117_v50, %v3116_v49 }
 0x579   : > { %v2293_v35 = vmul.f32 %v3426_v42, %v2285_v54  ;;  %v2318_v63 = vand.u32 4294901760, %v2299_v53  ;;  %v2303_v0 = vadd.f32 %v2299_v53, %v4602_v59 }
 0x57a   : > { %v4190_v56 = vpop.eup %4189  ;;  %v2415_v1 = vsub.f32 %v2300_v52, %v2321_v57  ;;  %2308 = vst.msk [vmem:[#allocation4 + $0x8] sm:$0xff] %vm1703_vm10, %v2304_v55  ;;  %v3118_v55 = vld [vmem:[%s4351_s27 + $0x70] sm:$0xff] }
 0x57b   : > { %v2301_v3 = vadd.f32 %v3427_v46, %v2293_v35  ;;  %v2286_v4 = vmul.f32 %v4190_v56, %v4650_v7  ;;  %v4691_v5 = vpack.c.bf16 %v2321_v57, %v2318_v63  ;;  %v2408_v6 = vsub.f32 %v2299_v53, %v2318_v63  ;;  %2307 = vst.msk [vmem:[#allocation4] sm:$0xff] %vm1703_vm10, %v2303_v0  ;;  %v3119_v35 = vld [vmem:[%s4351_s27 + $0x78] sm:$0xff]  ;;  %v3439_v0 = vld [vmem:[%s4356_s30 + $0x1] ss:$0 sm:$0xff] }
 0x57c   : > { %v2416_v2 = vand.u32 4294901760, %v2415_v1  ;;  %v4090_v63 = vpack.c.bf16 %v3119_v35, %v3118_v55 }
 0x57d   : > { %v2294_v60 = vmul.f32 %v3426_v42, %v2286_v4  ;;  %4015 = vmatprep.subr.bf16.mxu1 %v4691_v5  ;;  %v2324_v9 = vand.u32 4294901760, %v2301_v3  ;;  %v2409_v59 = vand.u32 4294901760, %v2408_v6  ;;  %v2305_v11 = vadd.f32 %v2301_v3, %v4609_v61 }
 0x57e   : > { %4017 = vmatpush3.bf16.msra.mxu1 %v4691_v5  ;;  %v2417_v10 = vsub.f32 %v2415_v1, %v2416_v2  ;;  %v2400_v61 = vand.u32 4294901760, %v2399_v31  ;;  %v4030_v38 = vpack.c.bf16 %v2415_v1, %v2408_v6 }
 0x57f   : > { %v2302_v12 = vadd.f32 %v3427_v46, %v2294_v60  ;;  %v2410_v7 = vsub.f32 %v2408_v6, %v2409_v59  ;;  %v2422_v15 = vsub.f32 %v2301_v3, %v2324_v9  ;;  %2309 = vst.msk [vmem:[#allocation4 + $0x10] sm:$0xff] %vm1703_vm10, %v2305_v11  ;;  %v4046_v19 = vpack.c.bf16 %v2416_v2, %v2409_v59  ;;  %v3026_v46 = vld [vmem:[%s4351_s27 + $0x50] sm:$0xff]  ;;  %v3442_v2 = vld [vmem:[%s4356_s30 + $0x2] ss:$0 sm:$0xff] }
 0x580   : > { %v2418_v17 = vand.u32 4294901760, %v2417_v10  ;;  %v4082_v48 = vpack.c.bf16 %v3027_v47, %v3026_v46 }
 0x581   : > { %v2327_v21 = vand.u32 4294901760, %v2302_v12  ;;  %v2411_v22 = vand.u32 4294901760, %v2410_v7  ;;  %v2423_v23 = vand.u32 4294901760, %v2422_v15  ;;  %v2306_v24 = vadd.f32 %v2302_v12, %v4615_v62 }
 0x583   : > { %v4018_v25 = vpack.c.bf16 %v2327_v21, %v2324_v9  ;;  %v2429_v26 = vsub.f32 %v2302_v12, %v2327_v21  ;;  %2310 = vst.msk [vmem:[#allocation4 + $0x18] sm:$0xff] %vm1703_vm10, %v2306_v24  ;;  %v4022_v27 = vpack.c.bf16 %v2418_v17, %v2411_v22  ;;  %v2424_v32 = vsub.f32 %v2422_v15, %v2423_v23 }
 0x585   : > { %4019 = vmatprep.subr.bf16.mxu1 %v4018_v25  ;;  %v2430_v28 = vand.u32 4294901760, %v2429_v26  ;;  %v2425_v33 = vand.u32 4294901760, %v2424_v32  ;;  %v4034_v30 = vpack.c.bf16 %v2429_v26, %v2422_v15 }
 0x586   : > { %4021 = vmatpush3.bf16.msra.mxu1 %v4018_v25 }
 0x587   : > { %4023 = vmatprep.subr.bf16.mxu1 %v4022_v27  ;;  %v2431_v29 = vsub.f32 %v2429_v26, %v2430_v28  ;;  %v4050_v36 = vpack.c.bf16 %v2430_v28, %v2423_v23 }
 0x589   : > { %3825 = vmatmul.mubr.f32.vlgmr.msra.gmra.mrb[12].mxu1 %v2400_v61  ;;  %v2432_v34 = vand.u32 4294901760, %v2431_v29 }
 0x58a   : > { %4025 = vmatpush3.bf16.msra.mxu1 %v4022_v27  ;;  %3835 = vmatprep.mubr.msk.f32.mxu1 %vm1703_vm10, %v4661_v16 }
 0x58b   : > { %v4026_v62 = vpack.c.bf16 %v2432_v34, %v2425_v33 }
 0x58d   : > { %4027 = vmatprep.subr.bf16.mxu1 %v4026_v62 }
 0x58e   : > { %4029 = vmatpush3.bf16.msra.mxu1 %v4026_v62 }
 0x58f   : > { %4031 = vmatprep.subr.bf16.mxu1 %v4030_v38 }
 0x591   : > { %3836 = vmatmul.mubr.msk.f32.vlgmr.msra.gmra.mrb[12].mxu1 %vm1703_vm10, %v4678_v45 }
 0x592   : > { %4033 = vmatpush3.bf16.msra.mxu1 %v4030_v38  ;;  %3846 = vmatprep.mubr.f32.mxu1 %v4665_v18  ;;  %v2845_v18 = vld [vmem:[%s4351_s27] sm:$0xff] }
 0x593   : > { %4035 = vmatprep.subr.bf16.mxu1 %v4034_v30 }
 0x596   : > { %4037 = vmatpush3.bf16.msra.mxu1 %v4034_v30 }
 0x597   : > { %4039 = vmatprep.subr.bf16.mxu1 %v4691_v5 }
 0x599   : > { %3847 = vmatmul.mubr.f32.vlgmr.msra.gmra.mrb[12].mxu1 %v4685_v58 }
 0x59a   : > { %4041 = vmatpush3.bf16.msra.mxu1 %v4691_v5  ;;  %3857 = vmatprep.mubr.f32.mxu1 %v2388_v20  ;;  %v2846_v20 = vld [vmem:[%s4351_s27 + $0x8] sm:$0xff] }
 0x59b   : > { %4043 = vmatprep.subr.bf16.mxu1 %v4018_v25  ;;  %v4070_v37 = vpack.c.bf16 %v2846_v20, %v2845_v18 }
 0x59d   : > { %4071 = vmatprep.subr.bf16.mxu0 %v4070_v37 }
 0x59e   : > { %4045 = vmatpush3.bf16.msra.mxu1 %v4018_v25 }
 0x59f   : > { %4047 = vmatprep.subr.bf16.mxu1 %v4046_v19 }
 0x5a1   : > { %3858 = vmatmul.mubr.f32.vlgmr.msra.gmra.mrb[12].mxu1 %v2398_v8 }
 0x5a2   : > { %4049 = vmatpush3.bf16.msra.mxu1 %v4046_v19  ;;  %3868 = vmatprep.mubr.msk.f32.mxu1 %vm1703_vm10, %v4661_v16 }
 0x5a3   : > { %4051 = vmatprep.subr.bf16.mxu1 %v4050_v36 }
 0x5a6   : > { %4053 = vmatpush3.bf16.msra.mxu1 %v4050_v36 }
 0x5a7   : > { %4055 = vmatprep.subr.bf16.mxu1 %v4691_v5 }
 0x5a9   : > { %3869 = vmatmul.mubr.msk.f32.vlgmr.msra.gmra.mrb[12].mxu1 %vm1703_vm10, %v4678_v45 }
 0x5aa   : > { %4057 = vmatpush3.bf16.msra.mxu1 %v4691_v5  ;;  %3879 = vmatprep.mubr.msk.f32.mxu1 %vm1703_vm10, %v4661_v16  ;;  %v3025_v16 = vld [vmem:[%s4351_s27 + $0x48] sm:$0xff]  ;;  %s3269_s27 = sshll.u32 %s4267_s20, 4  ;;  %s3270_s27 = int_to_ptr.vmem [resolvable:$true] %s3269_s27 }
 0x5ab   : > { %4059 = vmatprep.subr.bf16.mxu1 %v4018_v25  ;;  %s4197_s12 = scalar_lea.vmem %s3270_s27, 512  ;;  %p4204_p9 = scmp.lt.s32.totalorder %s3270_s27, %s3270_s27 }
 0x5ac   : > { %p4198_p6 = scmp.ne.s32.totalorder %s3270_s27, %s4197_s12  ;;  %p4205_p10 = scmp.lt.s32.totalorder %s4197_s12, %s4197_s12 }
 0x5ae   : > { %4061 = vmatpush3.bf16.msra.mxu1 %v4018_v25  ;;  %p4199_p7 = pnand %p4198_p6, %p4163_p5  ;;  %p4206_p11 = por %p4205_p10, %p4204_p9 }
 0x5b0   : > { %p4200_p8 = pneg %p4199_p7 }
 0x5b1   : > { %3880 = vmatmul.mubr.msk.f32.vlgmr.msra.gmra.mrb[12].mxu1 %vm1703_vm10, %v4678_v45  ;;  %v4078_v45 = vpack.c.bf16 %v3025_v16, %v3024_v44 }
 0x5b2   : > { %p4207_p12 = pnand %p4206_p11, %p4200_p8 }
 0x684   : > { %v3881_v41 = vpop.f32.mrb[12].mxu1 }
 0x685   : > { %v2835_v42 = vpop.f32.mrb[13].mxu1 }
 0x686   : > { %3890 = vmatprep.mubr.msk.f32.mxu0 %vm1703_vm10, %v2835_v42 }
 0x687   : > { %3891 = vmatmul.mubr.msk.f32.vlgmr.msra.gmra.mrb[8].mxu0 %vm1703_vm10, %v3881_v41 }
 0x688   : > { %4073 = vmatpush3.bf16.msra.mxu0 %v4070_v37  ;;  %3901 = vmatprep.mubr.msk.f32.mxu0 %vm1703_vm10, %v4395_v13  ;;  %v3438_v13 = vld [vmem:[%s4356_s30] ss:$0 sm:$0xff] }
 0x689   : > { %4075 = vmatprep.subr.bf16.mxu0 %v4074_v43 }
 0x68c   : > { %4077 = vmatpush3.bf16.msra.mxu0 %v4074_v43 }
 0x68d   : > { %4079 = vmatprep.subr.bf16.mxu0 %v4078_v45 }
 0x68f   : > { %3902 = vmatmul.mubr.msk.f32.vlgmr.msra.gmra.mrb[8].mxu0 %vm1703_vm10, %v4397_v14 }
 0x690   : > { %4081 = vmatpush3.bf16.msra.mxu0 %v4078_v45 }
 0x691   : > { %4083 = vmatprep.subr.bf16.mxu0 %v4082_v48 }
 0x694   : > { %4085 = vmatpush3.bf16.msra.mxu0 %v4082_v48 }
 0x695   : > { %4087 = vmatprep.subr.bf16.mxu0 %v4086_v51 }
 0x762   : > { %v3903_v52 = vpop.f32.mrb[8].mxu0 }
 0x763   : > { %v3021_v53 = vadd.f32 %v3903_v52, %v3438_v13  ;;  %v3006_v54 = vpop.f32.mrb[9].mxu0 }
 0x764   : > { %v3020_v57 = vadd.f32 %v3438_v13, %v3006_v54 }
 0x765   : > { %v3023_v14 = vmax.f32 %v3021_v53, 0.0 }
 0x766   : > { %v3022_v58 = vmax.f32 %v3020_v57, 0.0 }
 0x768   : > { %3912 = vmatprep.mubr.msk.f32.mxu0 %vm1703_vm10, %v3022_v58 }
 0x769   : > { %3913 = vmatmul.mubr.msk.f32.vlgmr.msra.gmra.mrb[10].mxu0 %vm1703_vm10, %v3023_v14 }
 0x76a   : > { %4089 = vmatpush3.bf16.msra.mxu0 %v4086_v51 }
 0x76b   : > { %4091 = vmatprep.subr.bf16.mxu0 %v4090_v63 }
 0x76e   : > { %4093 = vmatpush3.bf16.msra.mxu0 %v4090_v63 }
 0x83c   : > { %v3914_v56 = vpop.f32.mrb[10].mxu0 }
 0x83d   : > { %v3111_v1 = vadd.f32 %v3914_v56, %v3439_v0  ;;  %v3105_v3 = vpop.f32.mrb[11].mxu0 }
 0x83e   : > { %v3106_v4 = vadd.f32 %v3439_v0, %v3105_v3 }
 0x83f   : > { %v3115_v6 = vmax.f32 %v3111_v1, 0.0 }
 0x840   : > { %v3114_v5 = vmax.f32 %v3106_v4, 0.0 }
 0x842   : > { %3923 = vmatprep.mubr.msk.f32.mxu0 %vm1703_vm10, %v3114_v5 }
 0x843   : > { %3924 = vmatmul.mubr.msk.f32.vlgmr.msra.gmra.mrb[12].mxu0 %vm1703_vm10, %v3115_v6 }
 0x916   : > { %v3925_v8 = vpop.f32.mrb[12].mxu0 }
 0x917   : > { %v3203_v60 = vadd.f32 %v3925_v8, %v3442_v2  ;;  %v3197_v9 = vpop.f32.mrb[13].mxu0 }
 0x918   : > { %v3198_v59 = vadd.f32 %v3442_v2, %v3197_v9 }
 0x919   : > { %v3211_v10 = vsel %vm1703_vm10, %v3203_v60, 0.0 }
 0x91a   : > { %3212 = vadd.xlane.f32.xlu0 %v3211_v10  ;;  %v3208_v11 = vsel %vm1703_vm10, %v3198_v59, 0.0 }
 0x91b   : > { %3209 = vadd.xlane.f32.xlu1 %v3208_v11 }
 0x9a7   : > { %v3213_v12 = vpop.xlane.xlu0 %3212 }
 0x9a8   : > { %v3215_v7 = vmul.f32 0.03125, %v3213_v12  ;;  %v3210_v15 = vpop.xlane.xlu1 %3209 }
 0x9a9   : > { %v3214_v17 = vmul.f32 0.03125, %v3210_v15 }
 0x9aa   : > { %v3217_v31 = vsub.f32 %v3203_v60, %v3215_v7 }
 0x9ab   : > { %v3216_v21 = vsub.f32 %v3198_v59, %v3214_v17 }
 0x9ac   : > { %v3219_v22 = vmul.f32 %v3217_v31, %v3217_v31 }
 0x9ad   : > { %v3218_v23 = vmul.f32 %v3216_v21, %v3216_v21 }
 0x9ae   : > { %v3223_v24 = vsel %vm1703_vm10, %v3219_v22, 0.0 }
 0x9af   : > { %3224 = vadd.xlane.f32.xlu0 %v3223_v24  ;;  %v3220_v25 = vsel %vm1703_vm10, %v3218_v23, 0.0 }
 0x9b0   : > { %3221 = vadd.xlane.f32.xlu1 %v3220_v25 }
 0x9b1   : > { %4210 = shalt.err (!%p4207_p12)
}
 0x9b2   : > { %s4211_s18 = scalar_lea.hbm %s4819_s10, 512 }
 0x9b3   : > { %p4212_p13 = scmp.ne.s32.totalorder %s4819_s10, %s4211_s18  ;;  %p4217_p2 = scmp.lt.u32.totalorder %s4211_s18, %s4819_s10 }
 0x9b5   : > { %p4213_p0 = pnand %p4212_p13, %p4163_p5 }
 0x9b7   : > { %p4214_p1 = pneg %p4213_p0 }
 0x9b9   : > { %p4219_p3 = pnand %p4217_p2, %p4214_p1 }
 0x9bb   : > { %4222 = shalt.err (!%p4219_p3)
}
 0x9bc   : > { %s4268_s23 = smov 128   ;;  %s4269_s25 = smov 8   ;;  %v3445_v34 = vld [vmem:[%s4356_s30 + $0x3] ss:$0 sm:$0xff]  ;;  %v3446_v19 = vld [vmem:[%s4356_s30 + $0x4] ss:$0 sm:$0xff] }
 0x9bd   : > { %4158 = dma.vmem_to_hbm [thread:$0]  (%p4163_p5), %s3270_s27, 512, %s4819_s10, [#allocation5], %s4268_s23, %s4268_s23, %s4269_s25   ;;  %v4195_v39 = vld [vmem:[#allocation2 + $0x8] sm:$0xff]  ;;  %v4196_v41 = vld [vmem:[#allocation2] sm:$0xff] }
 0x9be   : > { %s4270_s29 = smov [#allocation2]  }
 0x9bf   : > { %s3256_s24 = sshll.u32 %s4270_s29, 4  ;;  %s3257_s24 = int_to_ptr.vmem [resolvable:$true] %s3256_s24 }
 0x9c0   : > { %s4223_s11 = scalar_lea.vmem %s3257_s24, 256  ;;  %p4230_p8 = scmp.lt.s32.totalorder %s3257_s24, %s3257_s24 }
 0x9c1   : > { %p4224_p4 = scmp.ne.s32.totalorder %s3257_s24, %s4223_s11  ;;  %p4231_p9 = scmp.lt.s32.totalorder %s4223_s11, %s4223_s11 }
 0x9c3   : > { %p4225_p6 = pnand %p4224_p4, %p4163_p5  ;;  %p4232_p10 = por %p4231_p9, %p4230_p8 }
 0x9c5   : > { %p4226_p7 = pneg %p4225_p6 }
 0x9c7   : > { %p4233_p11 = pnand %p4232_p10, %p4226_p7 }
 0xa3c   : > { %v3225_v26 = vpop.xlane.xlu0 %3224 }
 0xa3d   : > { %v3227_v27 = vmul.f32 0.03125, %v3225_v26  ;;  %v3222_v61 = vpop.xlane.xlu1 %3221 }
 0xa3e   : > { %v3226_v32 = vmul.f32 0.03125, %v3222_v61 }
 0xa3f   : > { %v3229_v28 = vadd.f32 1e-05, %v3227_v27 }
 0xa40   : > { %v3228_v29 = vadd.f32 1e-05, %v3226_v32 }
 0xa41   : > { %4191 = vrsqrt.f32 %v3229_v28 }
 0xa42   : > { %4193 = vrsqrt.f32 %v3228_v29 }
 0xa4b   : > { %v4192_v33 = vpop.eup %4191 }
 0xa4c   : > { %v4194_v62 = vpop.eup %4193  ;;  %v3233_v38 = vmul.f32 %v4192_v33, %v3217_v31 }
 0xa4d   : > { %v3232_v30 = vmul.f32 %v4194_v62, %v3216_v21 }
 0xa4e   : > { %v3239_v36 = vmul.f32 %v3445_v34, %v3233_v38 }
 0xa4f   : > { %v3238_v18 = vmul.f32 %v3445_v34, %v3232_v30 }
 0xa50   : > { %v3245_v20 = vadd.f32 %v3446_v19, %v3239_v36 }
 0xa51   : > { %v3244_v37 = vadd.f32 %v3446_v19, %v3238_v18 }
 0xa52   : > { %v3247_v40 = vadd.f32 %v4195_v39, %v3245_v20 }
 0xa53   : > { %v3246_v42 = vadd.f32 %v4196_v41, %v3244_v37 }
 0xa54   : > { %3249 = vst.msk [vmem:[#allocation2 + $0x8] sm:$0xff] %vm1703_vm10, %v3247_v40 }
 0xa55   : > { %3248 = vst.msk [vmem:[#allocation2] sm:$0xff] %vm1703_vm10, %v3246_v42 }
 0xa56   : > { %4236 = shalt.err (!%p4233_p11)
}
 0xa57   : > { %s4237_s27 = scalar_lea.hbm %s4818_s9, 256 }
 0xa58   : > { %p4238_p12 = scmp.ne.s32.totalorder %s4818_s9, %s4237_s27  ;;  %p4243_p1 = scmp.lt.u32.totalorder %s4237_s27, %s4818_s9 }
 0xa5a   : > { %p4239_p13 = pnand %p4238_p12, %p4163_p5 }
 0xa5c   : > { %p4240_p0 = pneg %p4239_p13 }
 0xa5e   : > { %p4245_p2 = pnand %p4243_p1, %p4240_p0 }
 0xa60   : > { %4248 = shalt.err (!%p4245_p2)
}
 0xa61   : > { %4156 = dma.vmem_to_hbm [thread:$0]  (%p4163_p5), %s3257_s24, 256, %s4818_s9, [#allocation3], %s4268_s23, %s4268_s23, %s4269_s25  }
 0xa62   : > { %4254 = dma.done.wait (%p4163_p5), [#allocation3], 256  }
 0xa63   : > { %4256 = vsyncadd (%p4163_p5), [#allocation3], 4294967040 }
 0xa64   : > { %4258 = dma.done.wait (%p4163_p5), [#allocation5], 512  }
 0xa65   : > { %4260 = vsyncadd (%p4163_p5), [#allocation5], 4294966784 }
 0xa66 PF: > { %s23_s13 = sadd.s32 1, %s4263_s13  }
 0xa67   : > { %p20_p3 = scmp.ge.s32.totalorder %s23_s13, 4  }
 0xa69   :  { %22 = sbr.rel (!%p20_p3) target bundleno = 2 (0x2), region = 104 }
 0xa70   :  { %3289 = vsyncpa [#allocation3], 1 }
 0xa71   :  { %3291 = vsyncpa [#allocation3 + $0x1], 1 }
 0xa72   :  { %3292 = vsyncpa [#allocation5], 1 }

</bundles_post_ra>
